<compile_context>
chip_gen: v7x
topology: tpu7x:2x2x1
jax: 0.10.0
libtpu: 0.0.40
codegen_flags: <defaults>
</compile_context>

<pallas_src>
import numpy as np
import jax
import jax.numpy as jnp
from jax import lax
from jax.experimental import pallas as pl
from jax.experimental.pallas import tpu as pltpu


# ----------------------------- kernel factories ------------------------------

def _make_conv_relu_pool_kernel(OW, PH, PW, KH, KW):
    """Fused Conv2d(KHxKW, VALID) + ReLU + MaxPool2d(2,2) for one NHWC image."""

    def kernel(x_ref, w_ref, b_ref, o_ref):
        w2d = w_ref[...]                        # (KH*KW*Cin, Cout) bf16
        b = b_ref[...]                          # (1, Cout) f32

        # 0/1 selection matrices: pooled column pw <- conv columns 2pw / 2pw+1.
        # Column down-sampling as a matmul keeps everything stride-free.
        pw_i = lax.broadcasted_iota(jnp.int32, (PW, OW), 0)
        ow_i = lax.broadcasted_iota(jnp.int32, (PW, OW), 1)
        sel_even = (ow_i == 2 * pw_i).astype(jnp.bfloat16)
        sel_odd = (ow_i == 2 * pw_i + 1).astype(jnp.bfloat16)

        def conv_row(rows):
            # rows: KH values of shape (W, Cin) bf16 -> ReLU conv row (OW, Cout) f32.
            # Single im2col matmul: patch lanes ordered (kh, kw, ci) to match
            # the host-side weight reshape.
            pieces = [rows[kh][kw:kw + OW, :]
                      for kh in range(KH) for kw in range(KW)]
            patch = jnp.concatenate(pieces, axis=-1)     # (OW, KH*KW*Cin) bf16
            acc = jnp.dot(patch, w2d, preferred_element_type=jnp.float32)
            return jnp.maximum(acc + b, 0.0)

        def body(ph, carry):
            r0 = 2 * ph
            rows = [x_ref[r0 + i] for i in range(KH + 1)]   # bf16 (W, Cin)
            c_top = conv_row(rows[0:KH])          # conv+ReLU output row 2*ph
            c_bot = conv_row(rows[1:KH + 1])      # conv+ReLU output row 2*ph + 1
            rmax = jnp.maximum(c_top, c_bot).astype(jnp.bfloat16)  # vertical pool
            pooled = jnp.maximum(                 # horizontal pool, (PW, Cout)
                jnp.dot(sel_even, rmax, preferred_element_type=jnp.float32),
                jnp.dot(sel_odd, rmax, preferred_element_type=jnp.float32))
            o_ref[ph] = pooled.astype(o_ref.dtype)
            return carry

        lax.fori_loop(0, PH, body, 0)

    return kernel


def _make_conv_relu_mean_heads_kernel(OH, OW, KH, KW):
    """Fused Conv2d(KHxKW) + ReLU + spatial mean + fc_logits/fc_shift heads."""

    def kernel(x_ref, w_ref, b_ref,
               wl1_ref, bl1_ref, wl2_ref, bl2_ref,
               ws1_ref, bs1_ref, ws2_ref, bs2_ref,
               logits_ref, shift_ref):
        cout = w_ref.shape[-1]
        w2d = w_ref[...]                        # (KH*KW*Cin, Cout) bf16
        b = b_ref[...]                          # (1, Cout) f32

        def body(oh, acc):
            rows = [x_ref[oh + kh] for kh in range(KH)]     # bf16 (W, Cin)
            pieces = [rows[kh][kw:kw + OW, :]
                      for kh in range(KH) for kw in range(KW)]
            patch = jnp.concatenate(pieces, axis=-1)        # (OW, KH*KW*Cin)
            s = jnp.dot(patch, w2d, preferred_element_type=jnp.float32)
            s = jnp.maximum(s + b, 0.0)                     # ReLU conv row
            return acc + jnp.sum(s, axis=0, keepdims=True)  # running (1, Cout) sum

        feat_sum = lax.fori_loop(0, OH, body, jnp.zeros((1, cout), jnp.float32))
        feat = feat_sum * (1.0 / float(OH * OW))            # spatial mean, (1, Cout)

        h = jnp.maximum(
            jnp.dot(feat, wl1_ref[...], preferred_element_type=jnp.float32)
            + bl1_ref[...], 0.0)
        logits = (jnp.dot(h, wl2_ref[...], preferred_element_type=jnp.float32)
                  + bl2_ref[...])
        logits_ref[...] = logits.astype(logits_ref.dtype)   # (1, d)

        g = jnp.maximum(
            jnp.dot(feat, ws1_ref[...], preferred_element_type=jnp.float32)
            + bs1_ref[...], 0.0)
        shift = (jnp.dot(g, ws2_ref[...], preferred_element_type=jnp.float32)
                 + bs2_ref[...])
        shift_ref[...] = shift.astype(shift_ref.dtype)      # (1, 1)

    return kernel


# ------------------------------ pallas wrappers -------------------------------

def _replicated(shape):
    nd = len(shape)

    def idx(bi):
        return (0,) * nd

    return pl.BlockSpec(shape, idx)


def conv_relu_pool(x, w, b, *, out_dtype=jnp.bfloat16):
    """x: (B,H,W,Cin) NHWC bf16, w: (KH,KW,Cin,Cout), b: (1,Cout).
    VALID conv + ReLU + 2x2 max-pool."""
    B, H, W, Cin = x.shape
    KH, KW, _, Cout = w.shape
    OH, OW = H - KH + 1, W - KW + 1
    PH, PW = OH // 2, OW // 2
    # Host-side: weights as a single (KH*KW*Cin, Cout) bf16 contraction matrix.
    w2d = w.reshape(KH * KW * Cin, Cout).astype(jnp.bfloat16)
    b2d = b.reshape(1, Cout).astype(jnp.float32)
    kernel = _make_conv_relu_pool_kernel(OW, PH, PW, KH, KW)
    return pl.pallas_call(
        kernel,
        out_shape=jax.ShapeDtypeStruct((B, PH, PW, Cout), out_dtype),
        grid=(B,),
        in_specs=[
            pl.BlockSpec((None, H, W, Cin), lambda bi: (bi, 0, 0, 0)),
            pl.BlockSpec((KH * KW * Cin, Cout), lambda bi: (0, 0)),
            pl.BlockSpec((1, Cout), lambda bi: (0, 0)),
        ],
        out_specs=pl.BlockSpec((None, PH, PW, Cout), lambda bi: (bi, 0, 0, 0)),
        compiler_params=pltpu.CompilerParams(
            dimension_semantics=("parallel",)),
    )(x, w2d, b2d)


def conv_relu_mean_heads(x, w, b, wl1, bl1, wl2, bl2, ws1, bs1, ws2, bs2):
    """Fused conv3 + ReLU + mean(dim=[-1,-2]) + fc_logits / fc_shift, per image."""
    B, H, W, Cin = x.shape
    KH, KW, _, Cout = w.shape
    OH, OW = H - KH + 1, W - KW + 1
    d = wl2.shape[1]
    w2d = w.reshape(KH * KW * Cin, Cout).astype(jnp.bfloat16)
    b2d = b.reshape(1, Cout).astype(jnp.float32)
    kernel = _make_conv_relu_mean_heads_kernel(OH, OW, KH, KW)
    logits3, shift3 = pl.pallas_call(
        kernel,
        out_shape=(jax.ShapeDtypeStruct((B, 1, d), jnp.float32),
                   jax.ShapeDtypeStruct((B, 1, 1), jnp.float32)),
        grid=(B,),
        in_specs=[
            pl.BlockSpec((None, H, W, Cin), lambda bi: (bi, 0, 0, 0)),
            _replicated(w2d.shape), _replicated(b2d.shape),
            _replicated(wl1.shape), _replicated(bl1.shape),
            _replicated(wl2.shape), _replicated(bl2.shape),
            _replicated(ws1.shape), _replicated(bs1.shape),
            _replicated(ws2.shape), _replicated(bs2.shape),
        ],
        out_specs=(pl.BlockSpec((None, 1, d), lambda bi: (bi, 0, 0)),
                   pl.BlockSpec((None, 1, 1), lambda bi: (bi, 0, 0))),
        compiler_params=pltpu.CompilerParams(
            dimension_semantics=("parallel",)),
    )(x, w2d, b2d, wl1, bl1, wl2, bl2, ws1, bs1, ws2, bs2)
    return logits3.reshape(B, d), shift3.reshape(B, 1)


# --------------------------- parameters (synthetic) --------------------------

def init_params(key, directions_count, num_channels=3, width=2):
    c_in = num_channels * 2
    c1, c2, c3 = 3 * width, 8 * width, 60 * width
    hidden = 42 * width
    d = int(np.prod(directions_count))
    ks = jax.random.split(key, 14)

    def rnd(k, shape, fan_in):
        return jax.random.normal(k, shape, jnp.float32) / np.sqrt(float(fan_in))

    return {
        # conv weights stored HWIO; biases as (1, Cout) rows
        'w1': rnd(ks[0], (2, 2, c_in, c1), 2 * 2 * c_in), 'b1': rnd(ks[1], (1, c1), c1),
        'w2': rnd(ks[2], (2, 2, c1, c2), 2 * 2 * c1),     'b2': rnd(ks[3], (1, c2), c2),
        'w3': rnd(ks[4], (4, 4, c2, c3), 4 * 4 * c2),     'b3': rnd(ks[5], (1, c3), c3),
        # fc weights stored (in, out)
        'wl1': rnd(ks[6], (c3, hidden), c3),    'bl1': rnd(ks[7], (1, hidden), hidden),
        'wl2': rnd(ks[8], (hidden, d), hidden), 'bl2': rnd(ks[9], (1, d), d),
        'ws1': rnd(ks[10], (c3, hidden), c3),   'bs1': rnd(ks[11], (1, hidden), hidden),
        'ws2': rnd(ks[12], (hidden, 1), hidden), 'bs2': rnd(ks[13], (1, 1), 1),
    }


# --------------------------------- forward -----------------------------------

def stylegan_reconstructor_forward(params, x1, x2, shape):
    """Matches StyleGANReconstructor.forward. x1, x2 are NCHW; shape[0] == batch."""
    batch = x1.shape[0]
    # cat along W (dim=3) then reshape to self.shape (done in NCHW, like torch)
    combined = jnp.reshape(jnp.concatenate([x1, x2], axis=3), shape)
    # NCHW -> NHWC; activations move through HBM as bf16 (f32 accumulation in-kernel)
    x = jnp.transpose(combined, (0, 2, 3, 1)).astype(jnp.bfloat16)

    x = conv_relu_pool(x, params['w1'], params['b1'])   # Conv2d(k=2) + ReLU + MaxPool
    x = conv_relu_pool(x, params['w2'], params['b2'])   # Conv2d(k=2) + ReLU + MaxPool
    logits, shift = conv_relu_mean_heads(                # Conv2d(k=4) + ReLU + mean + heads
        x, params['w3'], params['b3'],
        params['wl1'], params['bl1'], params['wl2'], params['bl2'],
        params['ws1'], params['bs1'], params['ws2'], params['bs2'])

    # features.view(batch_size, -1) is a no-op when shape[0] == batch_size
    logits = logits.reshape(batch, -1)
    return logits, jnp.squeeze(shift)                    # shift.squeeze()


# ------------------------- pure-JAX reference (f32) ---------------------------

def _reference_forward(params, x1, x2, shape):
    combined = jnp.reshape(jnp.concatenate([x1, x2], axis=3), shape)
    x = jnp.transpose(combined, (0, 2, 3, 1)).astype(jnp.float32)

    def conv_relu(x, w, b):
        y = lax.conv_general_dilated(x, w, (1, 1), 'VALID',
                                     dimension_numbers=('NHWC', 'HWIO', 'NHWC'))
        return jnp.maximum(y + b.reshape(1, 1, 1, -1), 0.0)

    def pool(x):
        B, H, W, C = x.shape
        PH, PW = H // 2, W // 2
        xt = x[:, :2 * PH, :2 * PW, :].reshape(B, PH, 2, PW, 2, C)
        return jnp.max(xt, axis=(2, 4))

    x = pool(conv_relu(x, params['w1'], params['b1']))
    x = pool(conv_relu(x, params['w2'], params['b2']))
    x = conv_relu(x, params['w3'], params['b3'])
    feat = jnp.mean(x, axis=(1, 2))
    h = jnp.maximum(feat @ params['wl1'] + params['bl1'], 0.0)
    logits = h @ params['wl2'] + params['bl2']
    g = jnp.maximum(feat @ params['ws1'] + params['bs1'], 0.0)
    shift = g @ params['ws2'] + params['bs2']
    return logits, jnp.squeeze(shift)


if __name__ == "__main__":
    key = jax.random.PRNGKey(0)
    batch, num_channels, H, W = 2, 3, 32, 32
    width = 2
    directions_count = 8
    # small analogue of the default shape=[14, 6, 256, 256]
    shape = (batch, num_channels * 2, 32, 32)

    k_p, k1, k2 = jax.random.split(key, 3)
    params = init_params(k_p, directions_count, num_channels=num_channels, width=width)
    x1 = jax.random.normal(k1, (batch, num_channels, H, W), jnp.float32)
    x2 = jax.random.normal(k2, (batch, num_channels, H, W), jnp.float32)

    fwd = jax.jit(lambda p, a, b: stylegan_reconstructor_forward(p, a, b, shape))
    logits, shift = fwd(params, x1, x2)
    jax.block_until_ready((logits, shift))

    assert logits.shape == (batch, directions_count), logits.shape
    assert shift.shape == (batch,), shift.shape
    assert bool(jnp.all(jnp.isfinite(logits))) and bool(jnp.all(jnp.isfinite(shift)))

    # loose-tolerance check vs a pure-JAX f32 reference (kernels use bf16 activations)
    ref_logits, ref_shift = jax.jit(
        lambda p, a, b: _reference_forward(p, a, b, shape))(params, x1, x2)
    assert float(jnp.max(jnp.abs(logits - ref_logits))) < 0.1
    assert float(jnp.max(jnp.abs(shift - ref_shift))) < 0.1

    print("KERNEL_OK")
</pallas_src>

<mosaic_0001>
module attributes {stable_mosaic.version = 11 : i64} {
  func.func @kernel(%arg0: i32, %arg1: memref<1x32x32x6xbf16, #tpu.memory_space<vmem>>, %arg2: memref<24x6xbf16, #tpu.memory_space<vmem>>, %arg3: memref<1x6xf32, #tpu.memory_space<vmem>>, %arg4: memref<1x15x15x6xbf16, #tpu.memory_space<vmem>>) attributes {dimension_semantics = [#tpu.dimension_semantics<parallel>], iteration_bounds = array<i64: 2>, scalar_prefetch = 0 : i64, scratch_operands = 0 : i64, tpu.core_type = #tpu.core_type<tc>, window_params = [{transform_indices = @transform_0, window_bounds = array<i64: 1, 32, 32, 6>}, {pipeline_mode = #tpu.pipeline_mode<synchronous>, transform_indices = @transform_1, window_bounds = array<i64: 24, 6>}, {pipeline_mode = #tpu.pipeline_mode<synchronous>, transform_indices = @transform_2, window_bounds = array<i64: 1, 6>}, {transform_indices = @transform_3, window_bounds = array<i64: 1, 15, 15, 6>}]} {
    %c0 = arith.constant 0 : index
    %c0_0 = arith.constant 0 : index
    %0 = vector.load %arg2[%c0, %c0_0] : memref<24x6xbf16, #tpu.memory_space<vmem>>, vector<24x6xbf16>
    %c0_1 = arith.constant 0 : index
    %c0_2 = arith.constant 0 : index
    %1 = vector.load %arg3[%c0_1, %c0_2] : memref<1x6xf32, #tpu.memory_space<vmem>>, vector<1x6xf32>
    %2 = tpu.iota {dimensions = array<i32: 0>} : vector<15x31xi32>
    %3 = tpu.iota {dimensions = array<i32: 1>} : vector<15x31xi32>
    %c2_i32 = arith.constant 2 : i32
    %4 = vector.broadcast %c2_i32 : i32 to vector<15x31xi32>
    %5 = arith.muli %4, %2 : vector<15x31xi32>
    %6 = arith.cmpi eq, %3, %5 : vector<15x31xi32>
    %7 = arith.extui %6 : vector<15x31xi1> to vector<15x31xi32>
    %8 = arith.sitofp %7 : vector<15x31xi32> to vector<15x31xf32>
    %9 = arith.truncf %8 : vector<15x31xf32> to vector<15x31xbf16>
    %c2_i32_3 = arith.constant 2 : i32
    %10 = vector.broadcast %c2_i32_3 : i32 to vector<15x31xi32>
    %11 = arith.muli %10, %2 : vector<15x31xi32>
    %c1_i32 = arith.constant 1 : i32
    %12 = vector.broadcast %c1_i32 : i32 to vector<15x31xi32>
    %13 = arith.addi %11, %12 : vector<15x31xi32>
    %14 = arith.cmpi eq, %3, %13 : vector<15x31xi32>
    %15 = arith.extui %14 : vector<15x31xi1> to vector<15x31xi32>
    %16 = arith.sitofp %15 : vector<15x31xi32> to vector<15x31xf32>
    %17 = arith.truncf %16 : vector<15x31xf32> to vector<15x31xbf16>
    %c0_i32 = arith.constant 0 : i32
    %c15_i32 = arith.constant 15 : i32
    %18 = arith.addi %c0_i32, %c15_i32 : i32
    %c1_i32_4 = arith.constant 1 : i32
    scf.for %arg5 = %c0_i32 to %18 step %c1_i32_4  : i32 {
      %c2_i32_6 = arith.constant 2 : i32
      %19 = arith.muli %c2_i32_6, %arg5 : i32
      %c0_i32_7 = arith.constant 0 : i32
      %20 = arith.addi %19, %c0_i32_7 : i32
      %c0_8 = arith.constant 0 : index
      %21 = arith.index_cast %20 : i32 to index
      %c0_9 = arith.constant 0 : index
      %c0_10 = arith.constant 0 : index
      %22 = vector.load %arg1[%c0_8, %21, %c0_9, %c0_10] : memref<1x32x32x6xbf16, #tpu.memory_space<vmem>>, vector<1x1x32x6xbf16>
      %23 = vector.shape_cast %22 : vector<1x1x32x6xbf16> to vector<32x6xbf16>
      %c1_i32_11 = arith.constant 1 : i32
      %24 = arith.addi %19, %c1_i32_11 : i32
      %c0_12 = arith.constant 0 : index
      %25 = arith.index_cast %24 : i32 to index
      %c0_13 = arith.constant 0 : index
      %c0_14 = arith.constant 0 : index
      %26 = vector.load %arg1[%c0_12, %25, %c0_13, %c0_14] : memref<1x32x32x6xbf16, #tpu.memory_space<vmem>>, vector<1x1x32x6xbf16>
      %27 = vector.shape_cast %26 : vector<1x1x32x6xbf16> to vector<32x6xbf16>
      %c2_i32_15 = arith.constant 2 : i32
      %28 = arith.addi %19, %c2_i32_15 : i32
      %c0_16 = arith.constant 0 : index
      %29 = arith.index_cast %28 : i32 to index
      %c0_17 = arith.constant 0 : index
      %c0_18 = arith.constant 0 : index
      %30 = vector.load %arg1[%c0_16, %29, %c0_17, %c0_18] : memref<1x32x32x6xbf16, #tpu.memory_space<vmem>>, vector<1x1x32x6xbf16>
      %31 = vector.shape_cast %30 : vector<1x1x32x6xbf16> to vector<32x6xbf16>
      %32 = vector.extract_strided_slice %23 {offsets = [0, 0], sizes = [31, 6], strides = [1, 1]} : vector<32x6xbf16> to vector<31x6xbf16>
      %33 = vector.extract_strided_slice %23 {offsets = [1, 0], sizes = [31, 6], strides = [1, 1]} : vector<32x6xbf16> to vector<31x6xbf16>
      %34 = vector.extract_strided_slice %27 {offsets = [0, 0], sizes = [31, 6], strides = [1, 1]} : vector<32x6xbf16> to vector<31x6xbf16>
      %35 = vector.extract_strided_slice %27 {offsets = [1, 0], sizes = [31, 6], strides = [1, 1]} : vector<32x6xbf16> to vector<31x6xbf16>
      %36 = tpu.concatenate %32, %33, %34, %35 in 1 : vector<31x6xbf16>, vector<31x6xbf16>, vector<31x6xbf16>, vector<31x6xbf16> -> vector<31x24xbf16>
      %cst = arith.constant dense<0.000000e+00> : vector<31x6xf32>
      %37 = tpu.matmul %36, %0, %cst {dimension_numbers = #tpu.dot_dimension_numbers<[1], [0], [0], [1], [0, 0, 1, 1], [], []>} : vector<31x24xbf16>, vector<24x6xbf16>, vector<31x6xf32> -> vector<31x6xf32>
      %38 = vector.broadcast %1 : vector<1x6xf32> to vector<31x6xf32>
      %39 = arith.addf %37, %38 : vector<31x6xf32>
      %cst_19 = arith.constant 0.000000e+00 : f32
      %40 = vector.broadcast %cst_19 : f32 to vector<31x6xf32>
      %41 = arith.maximumf %39, %40 : vector<31x6xf32>
      %42 = vector.extract_strided_slice %27 {offsets = [0, 0], sizes = [31, 6], strides = [1, 1]} : vector<32x6xbf16> to vector<31x6xbf16>
      %43 = vector.extract_strided_slice %27 {offsets = [1, 0], sizes = [31, 6], strides = [1, 1]} : vector<32x6xbf16> to vector<31x6xbf16>
      %44 = vector.extract_strided_slice %31 {offsets = [0, 0], sizes = [31, 6], strides = [1, 1]} : vector<32x6xbf16> to vector<31x6xbf16>
      %45 = vector.extract_strided_slice %31 {offsets = [1, 0], sizes = [31, 6], strides = [1, 1]} : vector<32x6xbf16> to vector<31x6xbf16>
      %46 = tpu.concatenate %42, %43, %44, %45 in 1 : vector<31x6xbf16>, vector<31x6xbf16>, vector<31x6xbf16>, vector<31x6xbf16> -> vector<31x24xbf16>
      %cst_20 = arith.constant dense<0.000000e+00> : vector<31x6xf32>
      %47 = tpu.matmul %46, %0, %cst_20 {dimension_numbers = #tpu.dot_dimension_numbers<[1], [0], [0], [1], [0, 0, 1, 1], [], []>} : vector<31x24xbf16>, vector<24x6xbf16>, vector<31x6xf32> -> vector<31x6xf32>
      %48 = vector.broadcast %1 : vector<1x6xf32> to vector<31x6xf32>
      %49 = arith.addf %47, %48 : vector<31x6xf32>
      %cst_21 = arith.constant 0.000000e+00 : f32
      %50 = vector.broadcast %cst_21 : f32 to vector<31x6xf32>
      %51 = arith.maximumf %49, %50 : vector<31x6xf32>
      %52 = arith.maximumf %41, %51 : vector<31x6xf32>
      %53 = arith.truncf %52 : vector<31x6xf32> to vector<31x6xbf16>
      %cst_22 = arith.constant dense<0.000000e+00> : vector<15x6xf32>
      %54 = tpu.matmul %9, %53, %cst_22 {dimension_numbers = #tpu.dot_dimension_numbers<[1], [0], [0], [1], [0, 0, 1, 1], [], []>} : vector<15x31xbf16>, vector<31x6xbf16>, vector<15x6xf32> -> vector<15x6xf32>
      %cst_23 = arith.constant dense<0.000000e+00> : vector<15x6xf32>
      %55 = tpu.matmul %17, %53, %cst_23 {dimension_numbers = #tpu.dot_dimension_numbers<[1], [0], [0], [1], [0, 0, 1, 1], [], []>} : vector<15x31xbf16>, vector<31x6xbf16>, vector<15x6xf32> -> vector<15x6xf32>
      %56 = arith.maximumf %54, %55 : vector<15x6xf32>
      %57 = arith.truncf %56 : vector<15x6xf32> to vector<15x6xbf16>
      %c0_24 = arith.constant 0 : index
      %58 = arith.index_cast %arg5 : i32 to index
      %c0_25 = arith.constant 0 : index
      %c0_26 = arith.constant 0 : index
      %59 = vector.load %arg4[%c0_24, %58, %c0_25, %c0_26] : memref<1x15x15x6xbf16, #tpu.memory_space<vmem>>, vector<1x1x15x6xbf16>
      %60 = vector.shape_cast %59 : vector<1x1x15x6xbf16> to vector<15x6xbf16>
      %61 = vector.shape_cast %57 : vector<15x6xbf16> to vector<1x1x15x6xbf16>
      tpu.vector_store %arg4[%c0_24, %58, %c0_25, %c0_26], %61 {strides = array<i32>} : memref<1x15x15x6xbf16, #tpu.memory_space<vmem>>, vector<1x1x15x6xbf16>,
    }
    %c15_i32_5 = arith.constant 15 : i32
    return
  }
  func.func @transform_0(%arg0: i32) -> (i32, i32, i32, i32) {
    %c0_i32 = arith.constant 0 : i32
    %c0_i32_0 = arith.constant 0 : i32
    %c0_i32_1 = arith.constant 0 : i32
    %c0_i32_2 = arith.constant 0 : i32
    return %arg0, %c0_i32, %c0_i32_0, %c0_i32_1 : i32, i32, i32, i32
  }
  func.func @transform_1(%arg0: i32) -> (i32, i32) {
    %c0_i32 = arith.constant 0 : i32
    %c0_i32_0 = arith.constant 0 : i32
    %c0_i32_1 = arith.constant 0 : i32
    return %c0_i32, %c0_i32_0 : i32, i32
  }
  func.func @transform_2(%arg0: i32) -> (i32, i32) {
    %c0_i32 = arith.constant 0 : i32
    %c0_i32_0 = arith.constant 0 : i32
    %c0_i32_1 = arith.constant 0 : i32
    return %c0_i32, %c0_i32_0 : i32, i32
  }
  func.func @transform_3(%arg0: i32) -> (i32, i32, i32, i32) {
    %c0_i32 = arith.constant 0 : i32
    %c0_i32_0 = arith.constant 0 : i32
    %c0_i32_1 = arith.constant 0 : i32
    %c0_i32_2 = arith.constant 0 : i32
    return %arg0, %c0_i32, %c0_i32_0, %c0_i32_1 : i32, i32, i32, i32
  }
}

module attributes {stable_mosaic.version = 11 : i64} {
  func.func @kernel(%arg0: i32, %arg1: memref<1x15x15x6xbf16, #tpu.memory_space<vmem>>, %arg2: memref<24x16xbf16, #tpu.memory_space<vmem>>, %arg3: memref<1x16xf32, #tpu.memory_space<vmem>>, %arg4: memref<1x7x7x16xbf16, #tpu.memory_space<vmem>>) attributes {dimension_semantics = [#tpu.dimension_semantics<parallel>], iteration_bounds = array<i64: 2>, scalar_prefetch = 0 : i64, scratch_operands = 0 : i64, tpu.core_type = #tpu.core_type<tc>, window_params = [{transform_indices = @transform_0, window_bounds = array<i64: 1, 15, 15, 6>}, {pipeline_mode = #tpu.pipeline_mode<synchronous>, transform_indices = @transform_1, window_bounds = array<i64: 24, 16>}, {pipeline_mode = #tpu.pipeline_mode<synchronous>, transform_indices = @transform_2, window_bounds = array<i64: 1, 16>}, {transform_indices = @transform_3, window_bounds = array<i64: 1, 7, 7, 16>}]} {
    %c0 = arith.constant 0 : index
    %c0_0 = arith.constant 0 : index
    %0 = vector.load %arg2[%c0, %c0_0] : memref<24x16xbf16, #tpu.memory_space<vmem>>, vector<24x16xbf16>
    %c0_1 = arith.constant 0 : index
    %c0_2 = arith.constant 0 : index
    %1 = vector.load %arg3[%c0_1, %c0_2] : memref<1x16xf32, #tpu.memory_space<vmem>>, vector<1x16xf32>
    %2 = tpu.iota {dimensions = array<i32: 0>} : vector<7x14xi32>
    %3 = tpu.iota {dimensions = array<i32: 1>} : vector<7x14xi32>
    %c2_i32 = arith.constant 2 : i32
    %4 = vector.broadcast %c2_i32 : i32 to vector<7x14xi32>
    %5 = arith.muli %4, %2 : vector<7x14xi32>
    %6 = arith.cmpi eq, %3, %5 : vector<7x14xi32>
    %7 = arith.extui %6 : vector<7x14xi1> to vector<7x14xi32>
    %8 = arith.sitofp %7 : vector<7x14xi32> to vector<7x14xf32>
    %9 = arith.truncf %8 : vector<7x14xf32> to vector<7x14xbf16>
    %c2_i32_3 = arith.constant 2 : i32
    %10 = vector.broadcast %c2_i32_3 : i32 to vector<7x14xi32>
    %11 = arith.muli %10, %2 : vector<7x14xi32>
    %c1_i32 = arith.constant 1 : i32
    %12 = vector.broadcast %c1_i32 : i32 to vector<7x14xi32>
    %13 = arith.addi %11, %12 : vector<7x14xi32>
    %14 = arith.cmpi eq, %3, %13 : vector<7x14xi32>
    %15 = arith.extui %14 : vector<7x14xi1> to vector<7x14xi32>
    %16 = arith.sitofp %15 : vector<7x14xi32> to vector<7x14xf32>
    %17 = arith.truncf %16 : vector<7x14xf32> to vector<7x14xbf16>
    %c0_i32 = arith.constant 0 : i32
    %c7_i32 = arith.constant 7 : i32
    %18 = arith.addi %c0_i32, %c7_i32 : i32
    %c1_i32_4 = arith.constant 1 : i32
    scf.for %arg5 = %c0_i32 to %18 step %c1_i32_4  : i32 {
      %c2_i32_6 = arith.constant 2 : i32
      %19 = arith.muli %c2_i32_6, %arg5 : i32
      %c0_i32_7 = arith.constant 0 : i32
      %20 = arith.addi %19, %c0_i32_7 : i32
      %c0_8 = arith.constant 0 : index
      %21 = arith.index_cast %20 : i32 to index
      %c0_9 = arith.constant 0 : index
      %c0_10 = arith.constant 0 : index
      %22 = vector.load %arg1[%c0_8, %21, %c0_9, %c0_10] : memref<1x15x15x6xbf16, #tpu.memory_space<vmem>>, vector<1x1x15x6xbf16>
      %23 = vector.shape_cast %22 : vector<1x1x15x6xbf16> to vector<15x6xbf16>
      %c1_i32_11 = arith.constant 1 : i32
      %24 = arith.addi %19, %c1_i32_11 : i32
      %c0_12 = arith.constant 0 : index
      %25 = arith.index_cast %24 : i32 to index
      %c0_13 = arith.constant 0 : index
      %c0_14 = arith.constant 0 : index
      %26 = vector.load %arg1[%c0_12, %25, %c0_13, %c0_14] : memref<1x15x15x6xbf16, #tpu.memory_space<vmem>>, vector<1x1x15x6xbf16>
      %27 = vector.shape_cast %26 : vector<1x1x15x6xbf16> to vector<15x6xbf16>
      %c2_i32_15 = arith.constant 2 : i32
      %28 = arith.addi %19, %c2_i32_15 : i32
      %c0_16 = arith.constant 0 : index
      %29 = arith.index_cast %28 : i32 to index
      %c0_17 = arith.constant 0 : index
      %c0_18 = arith.constant 0 : index
      %30 = vector.load %arg1[%c0_16, %29, %c0_17, %c0_18] : memref<1x15x15x6xbf16, #tpu.memory_space<vmem>>, vector<1x1x15x6xbf16>
      %31 = vector.shape_cast %30 : vector<1x1x15x6xbf16> to vector<15x6xbf16>
      %32 = vector.extract_strided_slice %23 {offsets = [0, 0], sizes = [14, 6], strides = [1, 1]} : vector<15x6xbf16> to vector<14x6xbf16>
      %33 = vector.extract_strided_slice %23 {offsets = [1, 0], sizes = [14, 6], strides = [1, 1]} : vector<15x6xbf16> to vector<14x6xbf16>
      %34 = vector.extract_strided_slice %27 {offsets = [0, 0], sizes = [14, 6], strides = [1, 1]} : vector<15x6xbf16> to vector<14x6xbf16>
      %35 = vector.extract_strided_slice %27 {offsets = [1, 0], sizes = [14, 6], strides = [1, 1]} : vector<15x6xbf16> to vector<14x6xbf16>
      %36 = tpu.concatenate %32, %33, %34, %35 in 1 : vector<14x6xbf16>, vector<14x6xbf16>, vector<14x6xbf16>, vector<14x6xbf16> -> vector<14x24xbf16>
      %cst = arith.constant dense<0.000000e+00> : vector<14x16xf32>
      %37 = tpu.matmul %36, %0, %cst {dimension_numbers = #tpu.dot_dimension_numbers<[1], [0], [0], [1], [0, 0, 1, 1], [], []>} : vector<14x24xbf16>, vector<24x16xbf16>, vector<14x16xf32> -> vector<14x16xf32>
      %38 = vector.broadcast %1 : vector<1x16xf32> to vector<14x16xf32>
      %39 = arith.addf %37, %38 : vector<14x16xf32>
      %cst_19 = arith.constant 0.000000e+00 : f32
      %40 = vector.broadcast %cst_19 : f32 to vector<14x16xf32>
      %41 = arith.maximumf %39, %40 : vector<14x16xf32>
      %42 = vector.extract_strided_slice %27 {offsets = [0, 0], sizes = [14, 6], strides = [1, 1]} : vector<15x6xbf16> to vector<14x6xbf16>
      %43 = vector.extract_strided_slice %27 {offsets = [1, 0], sizes = [14, 6], strides = [1, 1]} : vector<15x6xbf16> to vector<14x6xbf16>
      %44 = vector.extract_strided_slice %31 {offsets = [0, 0], sizes = [14, 6], strides = [1, 1]} : vector<15x6xbf16> to vector<14x6xbf16>
      %45 = vector.extract_strided_slice %31 {offsets = [1, 0], sizes = [14, 6], strides = [1, 1]} : vector<15x6xbf16> to vector<14x6xbf16>
      %46 = tpu.concatenate %42, %43, %44, %45 in 1 : vector<14x6xbf16>, vector<14x6xbf16>, vector<14x6xbf16>, vector<14x6xbf16> -> vector<14x24xbf16>
      %cst_20 = arith.constant dense<0.000000e+00> : vector<14x16xf32>
      %47 = tpu.matmul %46, %0, %cst_20 {dimension_numbers = #tpu.dot_dimension_numbers<[1], [0], [0], [1], [0, 0, 1, 1], [], []>} : vector<14x24xbf16>, vector<24x16xbf16>, vector<14x16xf32> -> vector<14x16xf32>
      %48 = vector.broadcast %1 : vector<1x16xf32> to vector<14x16xf32>
      %49 = arith.addf %47, %48 : vector<14x16xf32>
      %cst_21 = arith.constant 0.000000e+00 : f32
      %50 = vector.broadcast %cst_21 : f32 to vector<14x16xf32>
      %51 = arith.maximumf %49, %50 : vector<14x16xf32>
      %52 = arith.maximumf %41, %51 : vector<14x16xf32>
      %53 = arith.truncf %52 : vector<14x16xf32> to vector<14x16xbf16>
      %cst_22 = arith.constant dense<0.000000e+00> : vector<7x16xf32>
      %54 = tpu.matmul %9, %53, %cst_22 {dimension_numbers = #tpu.dot_dimension_numbers<[1], [0], [0], [1], [0, 0, 1, 1], [], []>} : vector<7x14xbf16>, vector<14x16xbf16>, vector<7x16xf32> -> vector<7x16xf32>
      %cst_23 = arith.constant dense<0.000000e+00> : vector<7x16xf32>
      %55 = tpu.matmul %17, %53, %cst_23 {dimension_numbers = #tpu.dot_dimension_numbers<[1], [0], [0], [1], [0, 0, 1, 1], [], []>} : vector<7x14xbf16>, vector<14x16xbf16>, vector<7x16xf32> -> vector<7x16xf32>
      %56 = arith.maximumf %54, %55 : vector<7x16xf32>
      %57 = arith.truncf %56 : vector<7x16xf32> to vector<7x16xbf16>
      %c0_24 = arith.constant 0 : index
      %58 = arith.index_cast %arg5 : i32 to index
      %c0_25 = arith.constant 0 : index
      %c0_26 = arith.constant 0 : index
      %59 = vector.load %arg4[%c0_24, %58, %c0_25, %c0_26] : memref<1x7x7x16xbf16, #tpu.memory_space<vmem>>, vector<1x1x7x16xbf16>
      %60 = vector.shape_cast %59 : vector<1x1x7x16xbf16> to vector<7x16xbf16>
      %61 = vector.shape_cast %57 : vector<7x16xbf16> to vector<1x1x7x16xbf16>
      tpu.vector_store %arg4[%c0_24, %58, %c0_25, %c0_26], %61 {strides = array<i32>} : memref<1x7x7x16xbf16, #tpu.memory_space<vmem>>, vector<1x1x7x16xbf16>,
    }
    %c7_i32_5 = arith.constant 7 : i32
    return
  }
  func.func @transform_0(%arg0: i32) -> (i32, i32, i32, i32) {
    %c0_i32 = arith.constant 0 : i32
    %c0_i32_0 = arith.constant 0 : i32
    %c0_i32_1 = arith.constant 0 : i32
    %c0_i32_2 = arith.constant 0 : i32
    return %arg0, %c0_i32, %c0_i32_0, %c0_i32_1 : i32, i32, i32, i32
  }
  func.func @transform_1(%arg0: i32) -> (i32, i32) {
    %c0_i32 = arith.constant 0 : i32
    %c0_i32_0 = arith.constant 0 : i32
    %c0_i32_1 = arith.constant 0 : i32
    return %c0_i32, %c0_i32_0 : i32, i32
  }
  func.func @transform_2(%arg0: i32) -> (i32, i32) {
    %c0_i32 = arith.constant 0 : i32
    %c0_i32_0 = arith.constant 0 : i32
    %c0_i32_1 = arith.constant 0 : i32
    return %c0_i32, %c0_i32_0 : i32, i32
  }
  func.func @transform_3(%arg0: i32) -> (i32, i32, i32, i32) {
    %c0_i32 = arith.constant 0 : i32
    %c0_i32_0 = arith.constant 0 : i32
    %c0_i32_1 = arith.constant 0 : i32
    %c0_i32_2 = arith.constant 0 : i32
    return %arg0, %c0_i32, %c0_i32_0, %c0_i32_1 : i32, i32, i32, i32
  }
}

module attributes {stable_mosaic.version = 11 : i64} {
  func.func @kernel(%arg0: i32, %arg1: memref<1x7x7x16xbf16, #tpu.memory_space<vmem>>, %arg2: memref<256x120xbf16, #tpu.memory_space<vmem>>, %arg3: memref<1x120xf32, #tpu.memory_space<vmem>>, %arg4: memref<120x84xf32, #tpu.memory_space<vmem>>, %arg5: memref<1x84xf32, #tpu.memory_space<vmem>>, %arg6: memref<84x8xf32, #tpu.memory_space<vmem>>, %arg7: memref<1x8xf32, #tpu.memory_space<vmem>>, %arg8: memref<120x84xf32, #tpu.memory_space<vmem>>, %arg9: memref<1x84xf32, #tpu.memory_space<vmem>>, %arg10: memref<84x1xf32, #tpu.memory_space<vmem>>, %arg11: memref<1x1xf32, #tpu.memory_space<vmem>>, %arg12: memref<1x1x8xf32, #tpu.memory_space<vmem>>, %arg13: memref<1x1x1xf32, #tpu.memory_space<vmem>>) attributes {dimension_semantics = [#tpu.dimension_semantics<parallel>], iteration_bounds = array<i64: 2>, scalar_prefetch = 0 : i64, scratch_operands = 0 : i64, tpu.core_type = #tpu.core_type<tc>, window_params = [{transform_indices = @transform_0, window_bounds = array<i64: 1, 7, 7, 16>}, {pipeline_mode = #tpu.pipeline_mode<synchronous>, transform_indices = @transform_1, window_bounds = array<i64: 256, 120>}, {pipeline_mode = #tpu.pipeline_mode<synchronous>, transform_indices = @transform_2, window_bounds = array<i64: 1, 120>}, {pipeline_mode = #tpu.pipeline_mode<synchronous>, transform_indices = @transform_3, window_bounds = array<i64: 120, 84>}, {pipeline_mode = #tpu.pipeline_mode<synchronous>, transform_indices = @transform_4, window_bounds = array<i64: 1, 84>}, {pipeline_mode = #tpu.pipeline_mode<synchronous>, transform_indices = @transform_5, window_bounds = array<i64: 84, 8>}, {pipeline_mode = #tpu.pipeline_mode<synchronous>, transform_indices = @transform_6, window_bounds = array<i64: 1, 8>}, {pipeline_mode = #tpu.pipeline_mode<synchronous>, transform_indices = @transform_7, window_bounds = array<i64: 120, 84>}, {pipeline_mode = #tpu.pipeline_mode<synchronous>, transform_indices = @transform_8, window_bounds = array<i64: 1, 84>}, {pipeline_mode = #tpu.pipeline_mode<synchronous>, transform_indices = @transform_9, window_bounds = array<i64: 84, 1>}, {pipeline_mode = #tpu.pipeline_mode<synchronous>, transform_indices = @transform_10, window_bounds = array<i64: 1, 1>}, {transform_indices = @transform_11, window_bounds = array<i64: 1, 1, 8>}, {transform_indices = @transform_12, window_bounds = array<i64: 1, 1, 1>}]} {
    %c0 = arith.constant 0 : index
    %c0_0 = arith.constant 0 : index
    %0 = vector.load %arg2[%c0, %c0_0] : memref<256x120xbf16, #tpu.memory_space<vmem>>, vector<256x120xbf16>
    %c0_1 = arith.constant 0 : index
    %c0_2 = arith.constant 0 : index
    %1 = vector.load %arg3[%c0_1, %c0_2] : memref<1x120xf32, #tpu.memory_space<vmem>>, vector<1x120xf32>
    %cst = arith.constant 0.000000e+00 : f32
    %2 = vector.broadcast %cst : f32 to vector<1x120xf32>
    %c0_i32 = arith.constant 0 : i32
    %c4_i32 = arith.constant 4 : i32
    %3 = arith.addi %c0_i32, %c4_i32 : i32
    %c1_i32 = arith.constant 1 : i32
    %4 = scf.for %arg14 = %c0_i32 to %3 step %c1_i32 iter_args(%arg15 = %2) -> (vector<1x120xf32>)  : i32 {
      %c0_i32_33 = arith.constant 0 : i32
      %33 = arith.addi %arg14, %c0_i32_33 : i32
      %c0_34 = arith.constant 0 : index
      %34 = arith.index_cast %33 : i32 to index
      %c0_35 = arith.constant 0 : index
      %c0_36 = arith.constant 0 : index
      %35 = vector.load %arg1[%c0_34, %34, %c0_35, %c0_36] : memref<1x7x7x16xbf16, #tpu.memory_space<vmem>>, vector<1x1x7x16xbf16>
      %36 = vector.shape_cast %35 : vector<1x1x7x16xbf16> to vector<7x16xbf16>
      %c1_i32_37 = arith.constant 1 : i32
      %37 = arith.addi %arg14, %c1_i32_37 : i32
      %c0_38 = arith.constant 0 : index
      %38 = arith.index_cast %37 : i32 to index
      %c0_39 = arith.constant 0 : index
      %c0_40 = arith.constant 0 : index
      %39 = vector.load %arg1[%c0_38, %38, %c0_39, %c0_40] : memref<1x7x7x16xbf16, #tpu.memory_space<vmem>>, vector<1x1x7x16xbf16>
      %40 = vector.shape_cast %39 : vector<1x1x7x16xbf16> to vector<7x16xbf16>
      %c2_i32 = arith.constant 2 : i32
      %41 = arith.addi %arg14, %c2_i32 : i32
      %c0_41 = arith.constant 0 : index
      %42 = arith.index_cast %41 : i32 to index
      %c0_42 = arith.constant 0 : index
      %c0_43 = arith.constant 0 : index
      %43 = vector.load %arg1[%c0_41, %42, %c0_42, %c0_43] : memref<1x7x7x16xbf16, #tpu.memory_space<vmem>>, vector<1x1x7x16xbf16>
      %44 = vector.shape_cast %43 : vector<1x1x7x16xbf16> to vector<7x16xbf16>
      %c3_i32 = arith.constant 3 : i32
      %45 = arith.addi %arg14, %c3_i32 : i32
      %c0_44 = arith.constant 0 : index
      %46 = arith.index_cast %45 : i32 to index
      %c0_45 = arith.constant 0 : index
      %c0_46 = arith.constant 0 : index
      %47 = vector.load %arg1[%c0_44, %46, %c0_45, %c0_46] : memref<1x7x7x16xbf16, #tpu.memory_space<vmem>>, vector<1x1x7x16xbf16>
      %48 = vector.shape_cast %47 : vector<1x1x7x16xbf16> to vector<7x16xbf16>
      %49 = vector.extract_strided_slice %36 {offsets = [0, 0], sizes = [4, 16], strides = [1, 1]} : vector<7x16xbf16> to vector<4x16xbf16>
      %50 = vector.extract_strided_slice %36 {offsets = [1, 0], sizes = [4, 16], strides = [1, 1]} : vector<7x16xbf16> to vector<4x16xbf16>
      %51 = vector.extract_strided_slice %36 {offsets = [2, 0], sizes = [4, 16], strides = [1, 1]} : vector<7x16xbf16> to vector<4x16xbf16>
      %52 = vector.extract_strided_slice %36 {offsets = [3, 0], sizes = [4, 16], strides = [1, 1]} : vector<7x16xbf16> to vector<4x16xbf16>
      %53 = vector.extract_strided_slice %40 {offsets = [0, 0], sizes = [4, 16], strides = [1, 1]} : vector<7x16xbf16> to vector<4x16xbf16>
      %54 = vector.extract_strided_slice %40 {offsets = [1, 0], sizes = [4, 16], strides = [1, 1]} : vector<7x16xbf16> to vector<4x16xbf16>
      %55 = vector.extract_strided_slice %40 {offsets = [2, 0], sizes = [4, 16], strides = [1, 1]} : vector<7x16xbf16> to vector<4x16xbf16>
      %56 = vector.extract_strided_slice %40 {offsets = [3, 0], sizes = [4, 16], strides = [1, 1]} : vector<7x16xbf16> to vector<4x16xbf16>
      %57 = vector.extract_strided_slice %44 {offsets = [0, 0], sizes = [4, 16], strides = [1, 1]} : vector<7x16xbf16> to vector<4x16xbf16>
      %58 = vector.extract_strided_slice %44 {offsets = [1, 0], sizes = [4, 16], strides = [1, 1]} : vector<7x16xbf16> to vector<4x16xbf16>
      %59 = vector.extract_strided_slice %44 {offsets = [2, 0], sizes = [4, 16], strides = [1, 1]} : vector<7x16xbf16> to vector<4x16xbf16>
      %60 = vector.extract_strided_slice %44 {offsets = [3, 0], sizes = [4, 16], strides = [1, 1]} : vector<7x16xbf16> to vector<4x16xbf16>
      %61 = vector.extract_strided_slice %48 {offsets = [0, 0], sizes = [4, 16], strides = [1, 1]} : vector<7x16xbf16> to vector<4x16xbf16>
      %62 = vector.extract_strided_slice %48 {offsets = [1, 0], sizes = [4, 16], strides = [1, 1]} : vector<7x16xbf16> to vector<4x16xbf16>
      %63 = vector.extract_strided_slice %48 {offsets = [2, 0], sizes = [4, 16], strides = [1, 1]} : vector<7x16xbf16> to vector<4x16xbf16>
      %64 = vector.extract_strided_slice %48 {offsets = [3, 0], sizes = [4, 16], strides = [1, 1]} : vector<7x16xbf16> to vector<4x16xbf16>
      %65 = tpu.concatenate %49, %50, %51, %52, %53, %54, %55, %56, %57, %58, %59, %60, %61, %62, %63, %64 in 1 : vector<4x16xbf16>, vector<4x16xbf16>, vector<4x16xbf16>, vector<4x16xbf16>, vector<4x16xbf16>, vector<4x16xbf16>, vector<4x16xbf16>, vector<4x16xbf16>, vector<4x16xbf16>, vector<4x16xbf16>, vector<4x16xbf16>, vector<4x16xbf16>, vector<4x16xbf16>, vector<4x16xbf16>, vector<4x16xbf16>, vector<4x16xbf16> -> vector<4x256xbf16>
      %cst_47 = arith.constant dense<0.000000e+00> : vector<4x120xf32>
      %66 = tpu.matmul %65, %0, %cst_47 {dimension_numbers = #tpu.dot_dimension_numbers<[1], [0], [0], [1], [0, 0, 1, 1], [], []>} : vector<4x256xbf16>, vector<256x120xbf16>, vector<4x120xf32> -> vector<4x120xf32>
      %67 = vector.broadcast %1 : vector<1x120xf32> to vector<4x120xf32>
      %68 = arith.addf %66, %67 : vector<4x120xf32>
      %cst_48 = arith.constant 0.000000e+00 : f32
      %69 = vector.broadcast %cst_48 : f32 to vector<4x120xf32>
      %70 = arith.maximumf %68, %69 : vector<4x120xf32>
      %cst_49 = arith.constant dense<0.000000e+00> : vector<120xf32>
      %71 = vector.multi_reduction <add>, %70, %cst_49 [0] : vector<4x120xf32> to vector<120xf32>
      %72 = vector.shape_cast %71 : vector<120xf32> to vector<1x120xf32>
      %73 = arith.addf %arg15, %72 : vector<1x120xf32>
      scf.yield %73 : vector<1x120xf32>
    }
    %c4_i32_3 = arith.constant 4 : i32
    %cst_4 = arith.constant 6.250000e-02 : f32
    %5 = vector.broadcast %cst_4 : f32 to vector<1x120xf32>
    %6 = arith.mulf %4, %5 : vector<1x120xf32>
    %c0_5 = arith.constant 0 : index
    %c0_6 = arith.constant 0 : index
    %7 = vector.load %arg4[%c0_5, %c0_6] : memref<120x84xf32, #tpu.memory_space<vmem>>, vector<120x84xf32>
    %cst_7 = arith.constant dense<0.000000e+00> : vector<1x84xf32>
    %8 = tpu.matmul %6, %7, %cst_7 {dimension_numbers = #tpu.dot_dimension_numbers<[1], [0], [0], [1], [0, 0, 1, 1], [], []>} : vector<1x120xf32>, vector<120x84xf32>, vector<1x84xf32> -> vector<1x84xf32>
    %c0_8 = arith.constant 0 : index
    %c0_9 = arith.constant 0 : index
    %9 = vector.load %arg5[%c0_8, %c0_9] : memref<1x84xf32, #tpu.memory_space<vmem>>, vector<1x84xf32>
    %10 = arith.addf %8, %9 : vector<1x84xf32>
    %cst_10 = arith.constant 0.000000e+00 : f32
    %11 = vector.broadcast %cst_10 : f32 to vector<1x84xf32>
    %12 = arith.maximumf %10, %11 : vector<1x84xf32>
    %c0_11 = arith.constant 0 : index
    %c0_12 = arith.constant 0 : index
    %13 = vector.load %arg6[%c0_11, %c0_12] : memref<84x8xf32, #tpu.memory_space<vmem>>, vector<84x8xf32>
    %cst_13 = arith.constant dense<0.000000e+00> : vector<1x8xf32>
    %14 = tpu.matmul %12, %13, %cst_13 {dimension_numbers = #tpu.dot_dimension_numbers<[1], [0], [0], [1], [0, 0, 1, 1], [], []>} : vector<1x84xf32>, vector<84x8xf32>, vector<1x8xf32> -> vector<1x8xf32>
    %c0_14 = arith.constant 0 : index
    %c0_15 = arith.constant 0 : index
    %15 = vector.load %arg7[%c0_14, %c0_15] : memref<1x8xf32, #tpu.memory_space<vmem>>, vector<1x8xf32>
    %16 = arith.addf %14, %15 : vector<1x8xf32>
    %c0_16 = arith.constant 0 : index
    %c0_17 = arith.constant 0 : index
    %c0_18 = arith.constant 0 : index
    %17 = vector.load %arg12[%c0_16, %c0_17, %c0_18] : memref<1x1x8xf32, #tpu.memory_space<vmem>>, vector<1x1x8xf32>
    %18 = vector.shape_cast %17 : vector<1x1x8xf32> to vector<1x8xf32>
    %19 = vector.shape_cast %16 : vector<1x8xf32> to vector<1x1x8xf32>
    tpu.vector_store %arg12[%c0_16, %c0_17, %c0_18], %19 {strides = array<i32>} : memref<1x1x8xf32, #tpu.memory_space<vmem>>, vector<1x1x8xf32>,
    %c0_19 = arith.constant 0 : index
    %c0_20 = arith.constant 0 : index
    %20 = vector.load %arg8[%c0_19, %c0_20] : memref<120x84xf32, #tpu.memory_space<vmem>>, vector<120x84xf32>
    %cst_21 = arith.constant dense<0.000000e+00> : vector<1x84xf32>
    %21 = tpu.matmul %6, %20, %cst_21 {dimension_numbers = #tpu.dot_dimension_numbers<[1], [0], [0], [1], [0, 0, 1, 1], [], []>} : vector<1x120xf32>, vector<120x84xf32>, vector<1x84xf32> -> vector<1x84xf32>
    %c0_22 = arith.constant 0 : index
    %c0_23 = arith.constant 0 : index
    %22 = vector.load %arg9[%c0_22, %c0_23] : memref<1x84xf32, #tpu.memory_space<vmem>>, vector<1x84xf32>
    %23 = arith.addf %21, %22 : vector<1x84xf32>
    %cst_24 = arith.constant 0.000000e+00 : f32
    %24 = vector.broadcast %cst_24 : f32 to vector<1x84xf32>
    %25 = arith.maximumf %23, %24 : vector<1x84xf32>
    %c0_25 = arith.constant 0 : index
    %c0_26 = arith.constant 0 : index
    %26 = vector.load %arg10[%c0_25, %c0_26] : memref<84x1xf32, #tpu.memory_space<vmem>>, vector<84x1xf32>
    %cst_27 = arith.constant dense<0.000000e+00> : vector<1x1xf32>
    %27 = tpu.matmul %25, %26, %cst_27 {dimension_numbers = #tpu.dot_dimension_numbers<[1], [0], [0], [1], [0, 0, 1, 1], [], []>} : vector<1x84xf32>, vector<84x1xf32>, vector<1x1xf32> -> vector<1x1xf32>
    %c0_28 = arith.constant 0 : index
    %c0_29 = arith.constant 0 : index
    %28 = vector.load %arg11[%c0_28, %c0_29] : memref<1x1xf32, #tpu.memory_space<vmem>>, vector<1x1xf32>
    %29 = arith.addf %27, %28 : vector<1x1xf32>
    %c0_30 = arith.constant 0 : index
    %c0_31 = arith.constant 0 : index
    %c0_32 = arith.constant 0 : index
    %30 = vector.load %arg13[%c0_30, %c0_31, %c0_32] : memref<1x1x1xf32, #tpu.memory_space<vmem>>, vector<1x1x1xf32>
    %31 = vector.shape_cast %30 : vector<1x1x1xf32> to vector<1x1xf32>
    %32 = vector.shape_cast %29 : vector<1x1xf32> to vector<1x1x1xf32>
    tpu.vector_store %arg13[%c0_30, %c0_31, %c0_32], %32 {strides = array<i32>} : memref<1x1x1xf32, #tpu.memory_space<vmem>>, vector<1x1x1xf32>,
    return
  }
  func.func @transform_0(%arg0: i32) -> (i32, i32, i32, i32) {
    %c0_i32 = arith.constant 0 : i32
    %c0_i32_0 = arith.constant 0 : i32
    %c0_i32_1 = arith.constant 0 : i32
    %c0_i32_2 = arith.constant 0 : i32
    return %arg0, %c0_i32, %c0_i32_0, %c0_i32_1 : i32, i32, i32, i32
  }
  func.func @transform_1(%arg0: i32) -> (i32, i32) {
    %c0_i32 = arith.constant 0 : i32
    %c0_i32_0 = arith.constant 0 : i32
    %c0_i32_1 = arith.constant 0 : i32
    return %c0_i32, %c0_i32_0 : i32, i32
  }
  func.func @transform_2(%arg0: i32) -> (i32, i32) {
    %c0_i32 = arith.constant 0 : i32
    %c0_i32_0 = arith.constant 0 : i32
    %c0_i32_1 = arith.constant 0 : i32
    return %c0_i32, %c0_i32_0 : i32, i32
  }
  func.func @transform_3(%arg0: i32) -> (i32, i32) {
    %c0_i32 = arith.constant 0 : i32
    %c0_i32_0 = arith.constant 0 : i32
    %c0_i32_1 = arith.constant 0 : i32
    return %c0_i32, %c0_i32_0 : i32, i32
  }
  func.func @transform_4(%arg0: i32) -> (i32, i32) {
    %c0_i32 = arith.constant 0 : i32
    %c0_i32_0 = arith.constant 0 : i32
    %c0_i32_1 = arith.constant 0 : i32
    return %c0_i32, %c0_i32_0 : i32, i32
  }
  func.func @transform_5(%arg0: i32) -> (i32, i32) {
    %c0_i32 = arith.constant 0 : i32
    %c0_i32_0 = arith.constant 0 : i32
    %c0_i32_1 = arith.constant 0 : i32
    return %c0_i32, %c0_i32_0 : i32, i32
  }
  func.func @transform_6(%arg0: i32) -> (i32, i32) {
    %c0_i32 = arith.constant 0 : i32
    %c0_i32_0 = arith.constant 0 : i32
    %c0_i32_1 = arith.constant 0 : i32
    return %c0_i32, %c0_i32_0 : i32, i32
  }
  func.func @transform_7(%arg0: i32) -> (i32, i32) {
    %c0_i32 = arith.constant 0 : i32
    %c0_i32_0 = arith.constant 0 : i32
    %c0_i32_1 = arith.constant 0 : i32
    return %c0_i32, %c0_i32_0 : i32, i32
  }
  func.func @transform_8(%arg0: i32) -> (i32, i32) {
    %c0_i32 = arith.constant 0 : i32
    %c0_i32_0 = arith.constant 0 : i32
    %c0_i32_1 = arith.constant 0 : i32
    return %c0_i32, %c0_i32_0 : i32, i32
  }
  func.func @transform_9(%arg0: i32) -> (i32, i32) {
    %c0_i32 = arith.constant 0 : i32
    %c0_i32_0 = arith.constant 0 : i32
    %c0_i32_1 = arith.constant 0 : i32
    return %c0_i32, %c0_i32_0 : i32, i32
  }
  func.func @transform_10(%arg0: i32) -> (i32, i32) {
    %c0_i32 = arith.constant 0 : i32
    %c0_i32_0 = arith.constant 0 : i32
    %c0_i32_1 = arith.constant 0 : i32
    return %c0_i32, %c0_i32_0 : i32, i32
  }
  func.func @transform_11(%arg0: i32) -> (i32, i32, i32) {
    %c0_i32 = arith.constant 0 : i32
    %c0_i32_0 = arith.constant 0 : i32
    %c0_i32_1 = arith.constant 0 : i32
    return %arg0, %c0_i32, %c0_i32_0 : i32, i32, i32
  }
  func.func @transform_12(%arg0: i32) -> (i32, i32, i32) {
    %c0_i32 = arith.constant 0 : i32
    %c0_i32_0 = arith.constant 0 : i32
    %c0_i32_1 = arith.constant 0 : i32
    return %arg0, %c0_i32, %c0_i32_0 : i32, i32, i32
  }
}

</mosaic_0001>

<bundles_post_ra>
// kernel: _lambda_.4
= control target key start
LH: loop header
LB: loop body
LE: loop exit
PB: predicated region body
PF: predicated region fallthrough
CT: control target
= control target key end

     0   :  { %s707_s12 = smov 0   ;;  %s786_s0 = inlined_call_operand.vmem [shape: bf16[2,15,15,6], index: 0, kind: input, shape index: {}]   ;;  %s787_s1 = inlined_call_operand.vmem [shape: bf16[24,16], index: 1, kind: input, shape index: {}]   ;;  %s788_s2 = inlined_call_operand.vmem [shape: f32[1,16], index: 2, kind: input, shape index: {}]   ;;  %s789_s3 = inlined_call_operand.vmem [shape: bf16[2,7,7,16], index: 3, kind: output, shape index: {}]  }
   0x1 LB: > { %s563_s13 = sadd.s32 4294967295, %s675_s12   ;;  %p567_p0 = scmp.ge.s32.totalorder %s675_s12, 1  ;;  %s675_s12 = sphi %s707_s12, %s13_s12  }
   0x2   : > { %p137_p1 = scmp.lt.s32.totalorder %s675_s12, 3 }
   0x4   : > { %p138_p2 = pnand %p567_p0, %p137_p1 }
   0x5   : > { %p161_p3 = scmp.lt.s32.totalorder (!%p138_p2), %s563_s13, 1  ;;  %v718_v0 = vld [vmem:[%s787_s1] sm:$0xf] (!%p138_p2)  ;;  %v723_v1 = vld [vmem:[%s787_s1 + $0x4] sm:$0xf] (!%p138_p2)  ;;  %v176_v2 = vlaneseq (!%p138_p2)  ;;  %v681_v9 = vmov (!%p138_p2), 0.0  }
   0x6   : > { %141 = sbr.rel (%p138_p2) target bundleno = 595 (0x253), region = 32  ;;  %v728_v3 = vld [vmem:[%s787_s1 + $0x8] sm:$0xf] (!%p138_p2)  ;;  %v733_v4 = vld [vmem:[%s788_s2] ss:$0 sm:$0xff] (!%p138_p2)  ;;  %s753_s30 = smov (!%p138_p2), 0  }
   0x7   : > { %v177_v5 = vshrl.u32 (!%p138_p2), %v176_v2, 7  ;;  %v179_v6 = vand.u32 (!%p138_p2), 127, %v176_v2 }
   0x9   : > { %v180_v7 = vmul.u32 (!%p138_p2), 2, %v177_v5 }
   0xb   : > { %vm181_vm0 = vcmp.eq.s32.totalorder (!%p138_p2), %v179_v6, %v180_v7  ;;  %v185_v8 = vadd.s32 (!%p138_p2), 1, %v180_v7 }
   0xc   : > { %v745_v10 = vsel (!%p138_p2), %vm181_vm0, 1.0, %v681_v9 }
   0xd   : > { %s791_s13 = smov (!%p161_p3, %s563_s13), 1  ;;  %v184_v11 = vpack.c.bf16 %v745_v10, %v745_v10  ;;  %vm186_vm1 = vcmp.eq.s32.totalorder %v179_v6, %v185_v8 }
   0xe   : > { %s638_s22 = smul.u32 120, %s791_s13  ;;  %v749_v12 = vsel %vm186_vm1, 1.0, %v681_v9 }
   0xf   : > { %s639_s23 = smul.u32 28, %s791_s13  ;;  %v189_v13 = vpack.c.bf16 %v749_v12, %v749_v12 }
  0x10   : > { %s738_s26 = scalar_lea.vmem %s786_s0, %s638_s22 }
  0x11   : > { %s743_s29 = scalar_lea.vmem %s789_s3, %s639_s23 }
  0x12 LB: >> { %v586_v14 = vcombine.low %v718_v0, %v723_v1  ;;  %v682_v15 = vmov 0.0   ;;  %v587_v16 = vcombine.low %v728_v3, %v728_v3  ;;  %s597_s4 = sshll.u32 %s679_s30, 4  ;;  %vm271_vm2 = vcmask 1043456   ;;  %s683_s6 = smov 12   ;;  %s679_s30 = sphi %s753_s30, %s195_s30  }
  0x13   : >> { %618 = vmatprep.subr.bf16.mxu1 %v682_v15  ;;  %610 = vmatprep.subr.bf16.mxu0 %v682_v15  ;;  %s199_s5 = scalar_lea.vmem %s738_s26, %s597_s4  ;;  %vm684_vm3 = vmmov 0   ;;  %s685_s7 = smov 6   ;;  %vm244_vm4 = vcmask 48128   ;;  %vm250_vm5 = vcmask 146432   ;;  %vm247_vm6 = vcmask 97280  }
  0x14   : >> { %619 = vmatpush3.bf16.msra.mxu1 %v586_v14  ;;  %611 = vmatpush3.bf16.msra.mxu0 %v586_v14  ;;  %v273_v17 = vsel %vm271_vm2, %v587_v16, 0  ;;  %v662_v18 = vld [vmem:[%s199_s5 + $0x8] sm:$0xff]   ;;  %v663_v19 = vld [vmem:[%s199_s5] sm:$0xff]   ;;  %v664_v20 = vld [vmem:[%s199_s5 + $0x10] sm:$0xff]   ;;  %s686_s8 = smov 18   ;;  %vm268_vm7 = vcmask 195584  }
  0x15   : >> { %620 = vmatprep.subr.bf16.mxu1 %v682_v15  ;;  %612 = vmatprep.subr.bf16.mxu0 %v682_v15  ;;  %v220_v21 = vshrl.u32 %v663_v19, 16  ;;  %v222_v22 = vshll.u32 %v663_v19, 16  ;;  %v238_v23 = vshll.u32 %v662_v18, 16  ;;  %v328_v24 = vshrl.u32 %v664_v20, 16  ;;  %s593_s9 = sshll.u32 %s679_s30, 2  ;;  %s195_s30 = sadd.s32 1, %s679_s30  }
  0x16   : >> { %233 = vrot.lane.b32.xlu1 %v662_v18, %s683_s6  ;;  %622 = vmatprep.mubr.msk.bf16.mxu1 %vm684_vm3, %v682_v15  ;;  %v330_v25 = vshll.u32 %v664_v20, 16  ;;  %v236_v27 = vshrl.u32 %v662_v18, 16  ;;  %vm394_vm8 = vcmask 1046528   ;;  %vm390_vm9 = vcmask 113664   ;;  %s484_s10 = scalar_lea.vmem %s743_s29, %s593_s9  ;;  %p192_p4 = scmp.ge.s32.totalorder %s195_s30, 7  }
  0x17   : >> { %614 = vmatprep.mubr.msk.bf16.mxu0 %vm684_vm3, %v682_v15  ;;  %v224_v26 = vrot.slane %v222_v22, 1  ;;  %v240_v28 = vrot.slane %v238_v23, 1  ;;  %vm485_vm10 = vcmask 125952   ;;  %vm486_vm11 = vsmask.f32 3328 }
  0x18   : >> { %621 = vmatpush3.bf16.msra.mxu1 %v273_v17  ;;  %613 = vmatpush3.bf16.msra.mxu0 %v273_v17  ;;  %v332_v29 = vrot.slane %v330_v25, 1  ;;  %vm487_vm12 = vmand %vm485_vm10, %vm486_vm11  ;;  %v488_v14 = vld [vmem:[%s484_s10] sm:$0xf] }
  0x19   : >> { %626 = vmatprep.subr.bf16.mxu0 %v682_v15  ;;  %632 = vmatprep.subr.bf16.mxu1 %v682_v15  ;;  %v225_v30 = vor.u32 %v224_v26, %v220_v21  ;;  %v241_v32 = vor.u32 %v240_v28, %v236_v27 }
  0x1a   : >> { %325 = vrot.lane.b32.xlu1 %v664_v20, %s683_s6  ;;  %v333_v31 = vor.u32 %v332_v29, %v328_v24 }
  0x1b   : >> { %226 = vrot.lane.b32.xlu0 %v225_v30, %s685_s7 }
  0x1e   : >> { %334 = vrot.lane.b32.xlu1 %v333_v31, %s686_s8 }
  0x1f   : >> { %318 = vrot.lane.b32.xlu0 %v241_v32, %s685_s7 }
  0x23   : >> { %242 = vrot.lane.b32.xlu0 %v241_v32, %s686_s8 }
  0x88   : >> { %v234_v33 = vpop.permute.xlu1 %233 }
  0x8c   : >> { %v326_v34 = vpop.permute.xlu1 %325 }
  0x8d   : >> { %v227_v35 = vpop.permute.xlu0 %226 }
  0x8e   : >> { %v246_v38 = vsel %vm244_vm4, %v663_v19, %v227_v35 }
  0x8f   : >> { %v249_v42 = vsel %vm247_vm6, %v246_v38, %v234_v33 }
  0x90   : >> { %v335_v37 = vpop.permute.xlu1 %334 }
  0x91   : >> { %v319_v36 = vpop.permute.xlu0 %318 }
  0x92   : >> { %v337_v39 = vsel %vm244_vm4, %v662_v18, %v319_v36 }
  0x93   : >> { %v339_v40 = vsel %vm247_vm6, %v337_v39, %v326_v34 }
  0x94   : >> { %v341_v41 = vsel %vm250_vm5, %v339_v40, %v335_v37 }
  0x95   : >> { %623 = vmatmul.mubr.msk.bf16.vlgmr.msra.gmra.mrb[0].mxu1 %vm268_vm7, %v341_v41  ;;  %v243_v43 = vpop.permute.xlu0 %242 }
  0x96   : >> { %v252_v44 = vsel %vm250_vm5, %v249_v42, %v243_v43  ;;  %634 = vmatprep.mubr.msk.bf16.mxu1 %vm684_vm3, %v682_v15 }
  0x97   : >> { %615 = vmatmul.mubr.msk.bf16.vlgmr.msra.gmra.mrb[0].mxu0 %vm268_vm7, %v252_v44 }
  0x98   : >> { %628 = vmatprep.mubr.msk.bf16.mxu0 %vm684_vm3, %v682_v15 }
 0x168   : >> { %v378_v45 = vpop.f32.mrb[0].mxu1 }
 0x169   : >> { %v379_v46 = vadd.f32 %v733_v4, %v378_v45  ;;  %v624_v47 = vpop.f32.mrb[1].mxu1 }
 0x16a   : >> { %v309_v48 = vpop.f32.mrb[0].mxu0  ;;  %v381_v49 = vpop.f32.mrb[2].mxu1 }
 0x16b   : >> { %v310_v50 = vadd.f32 %v733_v4, %v309_v48  ;;  %v382_v51 = vadd.f32 %v733_v4, %v381_v49  ;;  %v616_v52 = vpop.f32.mrb[1].mxu0  ;;  %v625_v53 = vpop.f32.mrb[3].mxu1  ;;  %v385_v55 = vmax.f32 %v379_v46, 0.0 }
 0x16c   : >> { %v312_v54 = vpop.f32.mrb[2].mxu0 }
 0x16d   : >> { %v316_v56 = vmax.f32 %v310_v50, 0.0  ;;  %v313_v57 = vadd.f32 %v733_v4, %v312_v54  ;;  %v617_v58 = vpop.f32.mrb[3].mxu0  ;;  %v386_v60 = vmax.f32 %v382_v51, 0.0 }
 0x16f   : >> { %v387_v59 = vmax.f32 %v316_v56, %v385_v55  ;;  %v317_v61 = vmax.f32 %v313_v57, 0.0 }
 0x171   : >> { %v388_v62 = vmax.f32 %v317_v61, %v386_v60 }
 0x173   : >> { %v389_v63 = vpack.c.bf16 %v388_v62, %v387_v59 }
 0x175   : >> { %v396_v2 = vsel %vm394_vm8, %v389_v63, 0 }
 0x176   : >> { %627 = vmatpush3.bf16.msra.mxu0 %v396_v2  ;;  %633 = vmatpush3.bf16.msra.mxu1 %v396_v2 }
 0x179   : >> { %629 = vmatmul.mubr.msk.bf16.vlgmr.msra.gmra.mrb[4].mxu0 %vm390_vm9, %v184_v11  ;;  %635 = vmatmul.mubr.msk.bf16.vlgmr.msra.gmra.mrb[4].mxu1 %vm390_vm9, %v189_v13 }
 0x24c   : >> { %v432_v5 = vpop.f32.mrb[4].mxu0  ;;  %v475_v6 = vpop.f32.mrb[4].mxu1  ;;  %194 = sbr.rel (!%p192_p4) target bundleno = 18 (0x12), region = 73 }
 0x24d   : >> { %v481_v7 = vmax.f32 %v432_v5, %v475_v6  ;;  %v630_v8 = vpop.f32.mrb[5].mxu0  ;;  %v636_v9 = vpop.f32.mrb[5].mxu1 }
 0x24e   : >> { %v435_v15 = vpop.f32.mrb[6].mxu0  ;;  %v478_v16 = vpop.f32.mrb[6].mxu1 }
 0x24f   : >> { %v482_v17 = vpack.c.bf16 %v481_v7, %v481_v7  ;;  %v631_v18 = vpop.f32.mrb[7].mxu0  ;;  %v637_v19 = vpop.f32.mrb[7].mxu1 }
 0x251   : >> { %v489_v20 = vsel %vm487_vm12, %v482_v17, %v488_v14 }
 0x252   : >> { %490 = vst [vmem:[%s484_s10] sm:$0xf] %v489_v20 }
 0x253 PF: > { %s13_s12 = sadd.s32 1, %s675_s12  }
 0x254   : > { %p10_p5 = scmp.ge.s32.totalorder %s13_s12, 4  }
 0x256   :  { %12 = sbr.rel (!%p10_p5) target bundleno = 1 (0x1), region = 84 }

// kernel: _lambda_.3
= control target key start
LH: loop header
LB: loop body
LE: loop exit
PB: predicated region body
PF: predicated region fallthrough
CT: control target
= control target key end

     0   :  { %s860_s12 = smov 0   ;;  %s983_s0 = inlined_call_operand.vmem [shape: bf16[2,32,32,6], index: 0, kind: input, shape index: {}]   ;;  %s984_s1 = inlined_call_operand.vmem [shape: bf16[24,6], index: 1, kind: input, shape index: {}]   ;;  %s985_s2 = inlined_call_operand.vmem [shape: f32[1,6], index: 2, kind: input, shape index: {}]   ;;  %s986_s3 = inlined_call_operand.vmem [shape: bf16[2,15,15,6], index: 3, kind: output, shape index: {}]  }
   0x1 LB: > { %s684_s13 = sadd.s32 4294967295, %s827_s12   ;;  %p688_p0 = scmp.ge.s32.totalorder %s827_s12, 1  ;;  %s827_s12 = sphi %s860_s12, %s13_s12  }
   0x2   : > { %p137_p1 = scmp.lt.s32.totalorder %s827_s12, 3 }
   0x4   : > { %p138_p2 = pnand %p688_p0, %p137_p1 }
   0x5   : > { %p161_p3 = scmp.lt.s32.totalorder (!%p138_p2), %s684_s13, 1  ;;  %v871_v0 = vld [vmem:[%s984_s1] sm:$0xf] (!%p138_p2)  ;;  %v876_v1 = vld [vmem:[%s984_s1 + $0x4] sm:$0xf] (!%p138_p2)  ;;  %v176_v2 = vlaneseq (!%p138_p2)  ;;  %v833_v11 = vmov (!%p138_p2), 0.0  }
   0x6   : > { %141 = sbr.rel (%p138_p2) target bundleno = 609 (0x261), region = 32  ;;  %v881_v3 = vld [vmem:[%s984_s1 + $0x8] sm:$0xf] (!%p138_p2)  ;;  %v886_v4 = vld [vmem:[%s985_s2] ss:$0 sm:$0xff] (!%p138_p2)  ;;  %s910_s30 = smov (!%p138_p2), 0  }
   0x7   : > { %v177_v5 = vshrl.u32 (!%p138_p2), %v176_v2, 7  ;;  %v180_v6 = vand.u32 (!%p138_p2), 127, %v176_v2 }
   0x9   : > { %v178_v7 = vadd.s32 (!%p138_p2), 8, %v177_v5  ;;  %v181_v8 = vmul.u32 (!%p138_p2), 2, %v177_v5 }
   0xb   : > { %v182_v9 = vmul.u32 (!%p138_p2), 2, %v178_v7  ;;  %vm183_vm0 = vcmp.eq.s32.totalorder (!%p138_p2), %v180_v6, %v181_v8  ;;  %v190_v10 = vadd.s32 (!%p138_p2), 1, %v181_v8 }
   0xc   : > { %v898_v12 = vsel (!%p138_p2), %vm183_vm0, 1.0, %v833_v11 }
   0xd   : > { %s988_s13 = smov (!%p161_p3, %s684_s13), 1  ;;  %vm184_vm1 = vcmp.eq.s32.totalorder %v180_v6, %v182_v9  ;;  %v191_v13 = vadd.s32 1, %v182_v9  ;;  %vm192_vm2 = vcmp.eq.s32.totalorder %v180_v6, %v190_v10 }
   0xe   : > { %s731_s22 = sshll.u32 %s988_s13, 9  ;;  %s787_s23 = smul.u32 120, %s988_s13  ;;  %v900_v14 = vsel %vm184_vm1, 1.0, %v833_v11  ;;  %v902_v15 = vsel %vm192_vm2, 1.0, %v833_v11 }
   0xf   : > { %s891_s26 = scalar_lea.vmem %s983_s0, %s731_s22  ;;  %v189_v16 = vpack.c.bf16 %v900_v14, %v898_v12  ;;  %vm193_vm3 = vcmp.eq.s32.totalorder %v180_v6, %v191_v13 }
  0x10   : > { %s896_s29 = scalar_lea.vmem %s986_s3, %s787_s23  ;;  %v906_v17 = vsel %vm193_vm3, 1.0, %v833_v11 }
  0x11   : > { %v198_v18 = vpack.c.bf16 %v906_v17, %v902_v15 }
  0x12 LB: >> { %s733_s4 = sshll.u32 %s831_s30, 5  ;;  %s834_s6 = smov 12   ;;  %v716_v23 = vcombine.low %v871_v0, %v876_v1  ;;  %vm239_vm4 = vsmask.f32 7424  ;;  %v717_v45 = vcombine.low %v881_v3, %v881_v3  ;;  %vm327_vm5 = vcmask 1043456   ;;  %s831_s30 = sphi %s910_s30, %s204_s30  }
  0x13   : >> { %s208_s5 = scalar_lea.vmem %s891_s26, %s733_s4  ;;  %s835_s7 = smov 6   ;;  %vm292_vm6 = vcmask 48128   ;;  %vm302_vm7 = vcmask 146432   ;;  %vm297_vm8 = vcmask 97280   ;;  %vm322_vm9 = vcmask 195584  }
  0x14   : >> { %v917_v19 = vld [vmem:[%s208_s5 + $0x10] sm:$0xff]   ;;  %v919_v20 = vld [vmem:[%s208_s5 + $0x18] sm:$0xff]   ;;  %v813_v21 = vld [vmem:[%s208_s5 + $0x20] sm:$0xff]   ;;  %761 = vmatprep.subr.bf16.mxu1 %v716_v23  ;;  %753 = vmatprep.subr.bf16.mxu0 %v716_v23  ;;  %v329_v47 = vsel %vm327_vm5, %v717_v45, 0  ;;  %s836_s8 = smov 18   ;;  %vm838_vm10 = vmmov 0  }
  0x15   : >> { %269 = vrot.lane.b32.xlu1 %v917_v19, %s834_s6  ;;  %v274_v22 = vshrl.u32 %v917_v19, 16  ;;  %271 = vrot.lane.b32.xlu0 %v919_v20, %s834_s6  ;;  %v281_v24 = vshll.u32 %v919_v20, 16  ;;  %v285_v25 = vshrl.u32 %v919_v20, 16  ;;  %v405_v26 = vshll.u32 %v813_v21, 16  ;;  %v930_v27 = vld [vmem:[%s208_s5 + $0x8] sm:$0xff]   ;;  %v815_v29 = vld [vmem:[%s208_s5] sm:$0xff]  }
  0x16   : >> { %v276_v30 = vshll.u32 %v917_v19, 16  ;;  %v816_v31 = vld [vmem:[%s208_s5 + $0x28] sm:$0xff]   ;;  %762 = vmatpush3.bf16.msra.mxu1 %v716_v23  ;;  %754 = vmatpush3.bf16.msra.mxu0 %v716_v23  ;;  %v248_v32 = vshll.u32 %v930_v27, 16  ;;  %v252_v33 = vshrl.u32 %v930_v27, 16  ;;  %v241_v35 = vshrl.u32 %v815_v29, 16  ;;  %s738_s9 = sshll.u32 %s831_s30, 3 }
  0x17   : >> { %v283_v28 = vrot.slane %v281_v24, 1  ;;  %v243_v36 = vshll.u32 %v815_v29, 16  ;;  %v403_v39 = vshrl.u32 %v813_v21, 16  ;;  %v407_v42 = vrot.slane %v405_v26, 1  ;;  %786 = vmatprep.subr.msk.bf16.mxu1 %vm327_vm5, %v717_v45  ;;  %785 = vmatprep.subr.msk.bf16.mxu0 %vm327_vm5, %v717_v45  ;;  %s603_s10 = scalar_lea.vmem %s896_s29, %s738_s9  ;;  %s204_s30 = sadd.s32 1, %s831_s30  }
  0x18   : >> { %v278_v37 = vrot.slane %v276_v30, 1  ;;  %v250_v38 = vrot.slane %v248_v32, 1  ;;  %v410_v43 = vshll.u32 %v816_v31, 16  ;;  %v414_v52 = vshrl.u32 %v816_v31, 16  ;;  %p201_p4 = scmp.ge.s32.totalorder %s204_s30, 15  }
  0x19   : >> { %398 = vrot.lane.b32.xlu1 %v813_v21, %s834_s6  ;;  %v287_v34 = vor.u32 %v285_v25, %v283_v28  ;;  %v245_v40 = vrot.slane %v243_v36, 1  ;;  %v408_v50 = vor.u32 %v407_v42, %v403_v39  ;;  %vm500_vm11 = vcmask 1046528  }
  0x1a   : >> { %v279_v41 = vor.u32 %v278_v37, %v274_v22  ;;  %v254_v44 = vor.u32 %v252_v33, %v250_v38  ;;  %v412_v51 = vrot.slane %v410_v43, 1  ;;  %764 = vmatpush3.bf16.msra.mxu1 %v329_v47  ;;  %756 = vmatpush3.bf16.msra.mxu0 %v329_v47  ;;  %vm501_vm12 = vcmask 1047552  }
  0x1b   : >> { %386 = vrot.lane.b32.xlu0 %v287_v34, %s835_s7  ;;  %v246_v46 = vor.u32 %v245_v40, %v241_v35  ;;  %vm496_vm13 = vcmask 252928   ;;  %vm604_vm14 = vcmask 44032   ;;  %vm607_vm15 = vsmask.f32 3328 }
  0x1c   : >> { %v284_v49 = vsel %vm239_vm4, %v279_v41, %v283_v28  ;;  %v413_v53 = vsel %vm239_vm4, %v408_v50, %v412_v51  ;;  %v416_v54 = vor.u32 %v414_v52, %v412_v51  ;;  %vm608_vm0 = vmand %vm604_vm14, %vm607_vm15 }
  0x1d   : >> { %257 = vrot.lane.b32.xlu1 %v254_v44, %s835_s7  ;;  %v251_v48 = vsel %vm239_vm4, %v246_v46, %v250_v38 }
  0x1f   : >> { %255 = vrot.lane.b32.xlu0 %v251_v48, %s835_s7 }
  0x21   : >> { %288 = vrot.lane.b32.xlu1 %v284_v49, %s836_s8 }
  0x23   : >> { %384 = vrot.lane.b32.xlu0 %v284_v49, %s835_s7 }
  0x25   : >> { %417 = vrot.lane.b32.xlu1 %v413_v53, %s836_s8  ;;  %v839_v53 = vmov 65535  }
  0x27   : >> { %400 = vrot.lane.b32.xlu0 %v816_v31, %s834_s6 }
  0x29   : >> { %419 = vrot.lane.b32.xlu1 %v416_v54, %s836_s8  ;;  %v502_v54 = vsel %vm500_vm11, 4294967295, %v839_v53 }
  0x2b   : >> { %290 = vrot.lane.b32.xlu0 %v287_v34, %s836_s8 }
  0x87   : >> { %v270_v55 = vpop.permute.xlu1 %269  ;;  %v272_v56 = vpop.permute.xlu0 %271 }
  0x8b   : >> { %v399_v57 = vpop.permute.xlu1 %398 }
  0x8d   : >> { %v387_v58 = vpop.permute.xlu0 %386 }
  0x8e   : >> { %v424_v10 = vsel %vm292_vm6, %v919_v20, %v387_v58  ;;  %v837_v20 = vmov 0.0   ;;  %v503_v58 = vsel %vm501_vm12, %v502_v54, 0 }
  0x8f   : >> { %v258_v59 = vpop.permute.xlu1 %257  ;;  %769 = vmatprep.subr.bf16.mxu0 %v837_v20  ;;  %777 = vmatprep.subr.bf16.mxu1 %v837_v20 }
  0x90   : >> { %v296_v13 = vsel %vm292_vm6, %v930_v27, %v258_v59 }
  0x91   : >> { %v256_v60 = vpop.permute.xlu0 %255 }
  0x92   : >> { %v294_v61 = vsel %vm292_vm6, %v815_v29, %v256_v60 }
  0x93   : >> { %v289_v62 = vpop.permute.xlu1 %288  ;;  %v299_v63 = vsel %vm297_vm8, %v294_v61, %v270_v55 }
  0x94   : >> { %v304_v2 = vsel %vm302_vm7, %v299_v63, %v289_v62 }
  0x95   : >> { %757 = vmatprep.mubr.msk.bf16.mxu0 %vm322_vm9, %v304_v2  ;;  %v385_v5 = vpop.permute.xlu0 %384 }
  0x96   : >> { %v422_v6 = vsel %vm292_vm6, %v917_v19, %v385_v5  ;;  %v301_v19 = vsel %vm297_vm8, %v296_v13, %v272_v56 }
  0x97   : >> { %v418_v7 = vpop.permute.xlu1 %417  ;;  %v426_v8 = vsel %vm297_vm8, %v422_v6, %v399_v57 }
  0x98   : >> { %v430_v9 = vsel %vm302_vm7, %v426_v8, %v418_v7 }
  0x99   : >> { %765 = vmatprep.mubr.msk.bf16.mxu1 %vm322_vm9, %v430_v9  ;;  %v401_v11 = vpop.permute.xlu0 %400 }
  0x9a   : >> { %v428_v21 = vsel %vm297_vm8, %v424_v10, %v401_v11  ;;  %v609_v11 = vld [vmem:[%s603_s10 + $0x4] sm:$0xf] }
  0x9b   : >> { %v420_v22 = vpop.permute.xlu1 %419 }
  0x9c   : >> { %v432_v23 = vsel %vm302_vm7, %v428_v21, %v420_v22 }
  0x9d   : >> { %766 = vmatmul.mubr.msk.bf16.vlgmr.msra.gmra.mrb[0].mxu1 %vm322_vm9, %v432_v23  ;;  %v291_v24 = vpop.permute.xlu0 %290 }
  0x9e   : >> { %v306_v25 = vsel %vm302_vm7, %v301_v19, %v291_v24  ;;  %781 = vmatprep.mubr.msk.bf16.mxu1 %vm838_vm10, %v837_v20 }
  0x9f   : >> { %758 = vmatmul.mubr.msk.bf16.vlgmr.msra.gmra.mrb[0].mxu0 %vm322_vm9, %v306_v25 }
  0xa0   : >> { %773 = vmatprep.mubr.msk.bf16.mxu0 %vm838_vm10, %v837_v20 }
 0x170   : >> { %v767_v26 = vpop.f32.mrb[0].mxu1 }
 0x171   : >> { %v480_v27 = vadd.f32 %v767_v26, %v886_v4  ;;  %v471_v28 = vpop.f32.mrb[1].mxu1 }
 0x172   : >> { %v472_v29 = vadd.f32 %v886_v4, %v471_v28  ;;  %v759_v30 = vpop.f32.mrb[0].mxu0  ;;  %v768_v31 = vpop.f32.mrb[2].mxu1 }
 0x173   : >> { %v374_v32 = vadd.f32 %v759_v30, %v886_v4  ;;  %v483_v33 = vadd.f32 %v768_v31, %v886_v4  ;;  %v365_v34 = vpop.f32.mrb[1].mxu0  ;;  %v474_v35 = vpop.f32.mrb[3].mxu1  ;;  %v488_v39 = vmax.f32 %v480_v27, 0.0 }
 0x174   : >> { %v366_v36 = vadd.f32 %v886_v4, %v365_v34  ;;  %v475_v37 = vadd.f32 %v886_v4, %v474_v35  ;;  %v760_v38 = vpop.f32.mrb[2].mxu0  ;;  %v486_v43 = vmax.f32 %v472_v29, 0.0 }
 0x175   : >> { %v382_v40 = vmax.f32 %v374_v32, 0.0  ;;  %v377_v41 = vadd.f32 %v760_v38, %v886_v4  ;;  %v368_v42 = vpop.f32.mrb[3].mxu0  ;;  %v489_v47 = vmax.f32 %v483_v33, 0.0 }
 0x176   : >> { %v380_v44 = vmax.f32 %v366_v36, 0.0  ;;  %v369_v45 = vadd.f32 %v886_v4, %v368_v42  ;;  %v487_v50 = vmax.f32 %v475_v37, 0.0 }
 0x177   : >> { %v492_v46 = vmax.f32 %v382_v40, %v488_v39  ;;  %v383_v48 = vmax.f32 %v377_v41, 0.0 }
 0x178   : >> { %v490_v49 = vmax.f32 %v380_v44, %v486_v43  ;;  %v381_v51 = vmax.f32 %v369_v45, 0.0 }
 0x179   : >> { %v493_v52 = vmax.f32 %v383_v48, %v489_v47 }
 0x17a   : >> { %v491_v55 = vmax.f32 %v381_v51, %v487_v50 }
 0x17b   : >> { %v495_v56 = vpack.c.bf16 %v493_v52, %v492_v46 }
 0x17c   : >> { %v494_v57 = vpack.c.bf16 %v491_v55, %v490_v49 }
 0x17d   : >> { %v505_v59 = vand.u32 %v503_v58, %v495_v56 }
 0x17e   : >> { %770 = vmatpush3.bf16.msra.mxu0 %v494_v57  ;;  %778 = vmatpush3.bf16.msra.mxu1 %v494_v57 }
 0x17f   : >> { %771 = vmatprep.subr.bf16.mxu0 %v837_v20  ;;  %779 = vmatprep.subr.bf16.mxu1 %v837_v20 }
 0x182   : >> { %772 = vmatpush3.bf16.msra.mxu0 %v505_v59  ;;  %780 = vmatpush3.bf16.msra.mxu1 %v505_v59 }
 0x185   : >> { %774 = vmatmul.mubr.msk.bf16.vlgmr.msra.gmra.mrb[4].mxu0 %vm496_vm13, %v189_v16  ;;  %782 = vmatmul.mubr.msk.bf16.vlgmr.msra.gmra.mrb[4].mxu1 %vm496_vm13, %v198_v18 }
 0x258   : >> { %v541_v60 = vpop.f32.mrb[4].mxu0  ;;  %v585_v61 = vpop.f32.mrb[4].mxu1 }
 0x259   : >> { %v592_v62 = vmax.f32 %v541_v60, %v585_v61  ;;  %v775_v63 = vpop.f32.mrb[5].mxu0  ;;  %v783_v2 = vpop.f32.mrb[5].mxu1 }
 0x25a   : >> { %v544_v5 = vpop.f32.mrb[6].mxu0  ;;  %v588_v6 = vpop.f32.mrb[6].mxu1  ;;  %203 = sbr.rel (!%p201_p4) target bundleno = 18 (0x12), region = 73 }
 0x25b   : >> { %v736_v7 = vpack.c.bf16 %v592_v62, %v592_v62  ;;  %v593_v8 = vmax.f32 %v544_v5, %v588_v6  ;;  %v776_v9 = vpop.f32.mrb[7].mxu0  ;;  %v784_v10 = vpop.f32.mrb[7].mxu1 }
 0x25d   : >> { %605 = vst.msk [vmem:[%s603_s10] sm:$0xf] %vm604_vm14, %v736_v7  ;;  %v737_v13 = vpack.c.bf16 %v593_v8, %v593_v8 }
 0x25f   : >> { %v610_v21 = vsel %vm608_vm0, %v737_v13, %v609_v11 }
 0x260   : >> { %611 = vst [vmem:[%s603_s10 + $0x4] sm:$0xf] %v610_v21 }
 0x261 PF: > { %s13_s12 = sadd.s32 1, %s827_s12  }
 0x262   : > { %p10_p5 = scmp.ge.s32.totalorder %s13_s12, 4  }
 0x264   :  { %12 = sbr.rel (!%p10_p5) target bundleno = 1 (0x1), region = 84 }

// kernel: _lambda_.5
= control target key start
LH: loop header
LB: loop body
LE: loop exit
PB: predicated region body
PF: predicated region fallthrough
CT: control target
= control target key end

     0   :  { %s2328_s0 = inlined_call_operand.vmem [shape: bf16[2,7,7,16], index: 0, kind: input, shape index: {}]   ;;  %s2329_s1 = inlined_call_operand.vmem [shape: bf16[256,120], index: 1, kind: input, shape index: {}]   ;;  %s2330_s2 = inlined_call_operand.vmem [shape: f32[1,120], index: 2, kind: input, shape index: {}]   ;;  %s2331_s3 = inlined_call_operand.vmem [shape: f32[120,84], index: 3, kind: input, shape index: {}]   ;;  %s2332_s4 = inlined_call_operand.vmem [shape: f32[1,84], index: 4, kind: input, shape index: {}]   ;;  %s2333_s5 = inlined_call_operand.vmem [shape: f32[84,8], index: 5, kind: input, shape index: {}]   ;;  %s2334_s6 = inlined_call_operand.vmem [shape: f32[1,8], index: 6, kind: input, shape index: {}]   ;;  %s2335_s7 = inlined_call_operand.vmem [shape: f32[120,84], index: 7, kind: input, shape index: {}]   ;;  %s2336_s8 = inlined_call_operand.vmem [shape: f32[1,84], index: 8, kind: input, shape index: {}]   ;;  %s2337_s9 = inlined_call_operand.vmem [shape: f32[84,1], index: 9, kind: input, shape index: {}]   ;;  %s2338_s10 = inlined_call_operand.<no memory space> [shape: f32[1,1], index: 10, kind: input, shape index: {}]   ;;  %s2339_s11 = inlined_call_operand.hbm [shape: f32[2,1,8], index: 11, kind: output, shape index: {0}]   ;;  %s2340_s12 = inlined_call_operand.vmem [shape: f32[2,1,1], index: 12, kind: output, shape index: {1}]  }
   0x1   :  { %v18_v0 = vstv %s2338_s10 }
   0x2   :  { %19 = vst [vmem:[#allocation2] sm:$0x1] %v18_v0 }
   0x3   :  { %20 = vsyncpa [#allocation4], 0 }
   0x4   :  { %22 = vsyncpa [#allocation4 + $0x1], 0  ;;  %s1763_s23 = smov 0   ;;  %s1765_s24 = smov 0  }
   0x5   :  { %s1767_s25 = smov 0   ;;  %s1769_s26 = smov 0  }
   0x6 LB: > { %2344 = sst [smem:[#allocation6_spill]] %s1670_s25  ;;  %s1784_s10 = sadd.s32 4294967295, %s1674_s26   ;;  %s1674_s26 = sphi %s1769_s26, %s2354_s26   ;;  %s1670_s25 = sphi %s1767_s25, %s2359_s25   ;;  %s1666_s24 = sphi %s1765_s24, %s2358_s24   ;;  %s1662_s23 = sphi %s1763_s23, %s2357_s23  }
   0x7   : > { %s1226_s27 = sadd.s32 4294967294, %s1674_s26   ;;  %s1788_s28 = sadd.s32 1, %s1674_s26  }
   0x8   : > { %2345 = sst [smem:[#allocation7_spill]] %s1788_s28  ;;  %s271_s29 = sadd.s32 1, %s1670_s25 }
   0x9   : > { %s268_s30 = ssub.s32 %s1674_s26, %s1788_s28  ;;  %p281_p0 = scmp.ne.s32.totalorder %s1670_s25, %s1666_s24 }
   0xa   : > { %p269_p1 = scmp.eq.s32.totalorder %s268_s30, 0  ;;  %p282_p2 = scmp.eq.s32.totalorder %s1784_s10, 1 }
   0xb   : > { %p287_p3 = scmp.ne.s32.totalorder %s1666_s24, %s1662_s23  ;;  %p288_p4 = scmp.eq.s32.totalorder %s1226_s27, 1 }
   0xc   : > { %s1799_s13 = scalar_select %p269_p1, %s1670_s25, %s271_s29  }
   0xd   : > { %p1801_p5 = por %p282_p2, %p281_p0  ;;  %p1805_p6 = por %p288_p4, %p287_p3 }
   0xe   : > { %2346 = sst [smem:[#allocation8_spill]] %s1799_s13  ;;  %p1229_p7 = scmp.ge.s32.totalorder %s1674_s26, 1 }
   0xf   : > { %p370_p8 = scmp.lt.s32.totalorder %s1674_s26, 3 }
  0x11   : > { %p371_p9 = pnand %p1229_p7, %p370_p8 }
  0x12   : > { %p414_p10 = scmp.lt.s32.totalorder (!%p371_p9), %s1784_s10, 1  ;;  %v1816_v1 = vld [vmem:[%s2329_s1] sm:$0xf] (!%p371_p9)  ;;  %v1821_v2 = vld [vmem:[%s2329_s1 + $0x4] sm:$0xf] (!%p371_p9)  ;;  %s2349_s18 = sand.u32 (!%p371_p9), 1, %s1666_s24  }
  0x13   : > { %374 = sbr.rel (%p371_p9) target bundleno = 1120 (0x460), region = 64  ;;  %v1826_v3 = vld [vmem:[%s2329_s1 + $0x8] sm:$0xf] (!%p371_p9)  ;;  %v1831_v4 = vld [vmem:[%s2329_s1 + $0xc] sm:$0xf] (!%p371_p9)  ;;  %s1993_s13 = scalar_lea.vmem (!%p371_p9), [#allocation3], %s2349_s18 }
  0x14   : > { %v1839_v5 = vld [vmem:[%s2329_s1 + $0x10] sm:$0xf] (!%p371_p9)  ;;  %v1844_v6 = vld [vmem:[%s2329_s1 + $0x14] sm:$0xf] (!%p371_p9)  ;;  %v1849_v7 = vld [vmem:[%s2329_s1 + $0x18] sm:$0xf] (!%p371_p9) }
  0x15   : > { %v1854_v8 = vld [vmem:[%s2329_s1 + $0x1c] sm:$0xf] (!%p371_p9)  ;;  %v1859_v9 = vld [vmem:[%s2329_s1 + $0x20] sm:$0xf] (!%p371_p9)  ;;  %v1869_v10 = vld [vmem:[%s2329_s1 + $0x24] sm:$0xf] (!%p371_p9) }
  0x16   : > { %v1874_v11 = vld [vmem:[%s2329_s1 + $0x28] sm:$0xf] (!%p371_p9)  ;;  %v1879_v12 = vld [vmem:[%s2329_s1 + $0x2c] sm:$0xf] (!%p371_p9)  ;;  %v1884_v13 = vld [vmem:[%s2329_s1 + $0x30] sm:$0xf] (!%p371_p9) }
  0x17   : > { %v1889_v14 = vld [vmem:[%s2329_s1 + $0x34] sm:$0xf] (!%p371_p9)  ;;  %v1899_v15 = vld [vmem:[%s2329_s1 + $0x38] sm:$0xf] (!%p371_p9)  ;;  %v1904_v16 = vld [vmem:[%s2329_s1 + $0x3c] sm:$0xf] (!%p371_p9) }
  0x18   : > { %v1909_v17 = vld [vmem:[%s2329_s1 + $0x40] sm:$0xf] (!%p371_p9)  ;;  %v1914_v18 = vld [vmem:[%s2329_s1 + $0x44] sm:$0xf] (!%p371_p9)  ;;  %v1919_v19 = vld [vmem:[%s2329_s1 + $0x48] sm:$0xf] (!%p371_p9) }
  0x19   : > { %v1924_v20 = vld [vmem:[%s2329_s1 + $0x4c] sm:$0xf] (!%p371_p9)  ;;  %v1929_v21 = vld [vmem:[%s2329_s1 + $0x50] sm:$0xf] (!%p371_p9)  ;;  %v1934_v22 = vld [vmem:[%s2329_s1 + $0x54] sm:$0xf] (!%p371_p9) }
  0x1a   : > { %s1834_s30 = scalar_select %p414_p10, %s1784_s10, 1  ;;  %v1939_v23 = vld [vmem:[%s2329_s1 + $0x58] sm:$0xf]  ;;  %v1944_v24 = vld [vmem:[%s2329_s1 + $0x5c] sm:$0xf]  ;;  %v1995_v34 = vmov 0.0  }
  0x1b   : > { %v1949_v25 = vld [vmem:[%s2329_s1 + $0x60] sm:$0xf]  ;;  %v1954_v26 = vld [vmem:[%s2329_s1 + $0x64] sm:$0xf]  ;;  %v1959_v27 = vld [vmem:[%s2329_s1 + $0x68] sm:$0xf] }
  0x1c   : > { %s1534_s16 = smul.u32 28, %s1834_s30  ;;  %v1964_v28 = vld [vmem:[%s2329_s1 + $0x6c] sm:$0xf]  ;;  %v1969_v29 = vld [vmem:[%s2329_s1 + $0x70] sm:$0xf]  ;;  %s1997_s19 = smov 0  }
  0x1d   : > { %v1974_v30 = vld [vmem:[%s2329_s1 + $0x74] sm:$0xf]  ;;  %v1979_v31 = vld [vmem:[%s2329_s1 + $0x78] sm:$0xf]  ;;  %v1984_v32 = vld [vmem:[%s2329_s1 + $0x7c] sm:$0xf] }
  0x1e   : > { %s1894_s21 = scalar_lea.vmem %s2328_s0, %s1534_s16  ;;  %v1989_v33 = vld [vmem:[%s2330_s2] ss:$0 sm:$0xff] }
  0x1f LB: >> { %v1251_v35 = vcombine.low %v1909_v17, %v1914_v18  ;;  %v1243_v36 = vcombine.low %v1816_v1, %v1821_v2  ;;  %v1252_v37 = vcombine.low %v1919_v19, %v1924_v20  ;;  %s1231_s16 = sshll.u32 %s1682_s19, 2  ;;  %v1244_v38 = vcombine.low %v1826_v3, %v1831_v4  ;;  %s1684_s20 = smov 64   ;;  %s1682_s19 = sphi %s1997_s19, %s461_s19   ;;  %v1678_v34 = vphi %v1995_v34, %v2351_v34  }
  0x20   : >> { %s464_s25 = scalar_lea.vmem %s1894_s21, %s1231_s16  ;;  %v1253_v40 = vcombine.low %v1929_v21, %v1934_v22  ;;  %v1245_v46 = vcombine.low %v1839_v5, %v1844_v6  ;;  %v1254_v50 = vcombine.low %v1939_v23, %v1944_v24  ;;  %s1685_s28 = smov 32   ;;  %v1246_v59 = vcombine.low %v1849_v7, %v1854_v8 }
  0x21   : >> { %1268 = vmatprep.subr.bf16.mxu0 %v1251_v35  ;;  %v2015_v39 = vld [vmem:[%s464_s25 + $0x4] ss:$0 sps:$4 sm:$0xff]   ;;  %v2019_v41 = vld [vmem:[%s464_s25 + $0xc] ss:$0 sps:$4 sm:$0xff]   ;;  %v2021_v42 = vld [vmem:[%s464_s25 + $0x8] sm:$0xf]  ;;  %v1255_v61 = vcombine.low %v1949_v25, %v1954_v26 }
  0x22   : >> { %1269 = vmatpush3.bf16.msra.mxu0 %v1243_v36  ;;  %v2023_v43 = vld [vmem:[%s464_s25] sm:$0xf]  ;;  %501 = vrot.lane.b32.xlu1 %v2015_v39, %s1684_s20  ;;  %v1240_v44 = vcombine.low %v2021_v42, %v2021_v42  ;;  %v506_v53 = vshll.u32 %v2015_v39, 16  ;;  %v504_v62 = vshrl.u32 %v2015_v39, 16  ;;  %v548_v0 = vshll.u32 %v2019_v41, 16  ;;  %s1686_s22 = smov 16  }
  0x23   : >> { %1270 = vmatprep.subr.bf16.mxu0 %v1252_v37  ;;  %v1238_v45 = vcombine.low %v2023_v43, %v2023_v43  ;;  %543 = vrot.lane.b32.xlu0 %v2019_v41, %s1684_s20  ;;  %s1687_s27 = smov 48   ;;  %s1688_s29 = smov 80   ;;  %vm562_vm0 = vcmask 130048   ;;  %vm566_vm1 = vcmask 261120   ;;  %vm569_vm2 = vcmask 392192  }
  0x24   : >> { %v532_v47 = vrot.slane %v1240_v44, 1  ;;  %v524_v48 = vshrl.u32 %v1240_v44, 16  ;;  %v526_v49 = vshll.u32 %v1240_v44, 16  ;;  %v508_v63 = vrot.slane %v506_v53, 1  ;;  %s1689_s17 = smov 96   ;;  %s1690_s18 = smov 112  }
  0x25   : >> { %v482_v51 = vshrl.u32 %v1238_v45, 16  ;;  %v484_v52 = vshll.u32 %v1238_v45, 16  ;;  %v490_v55 = vrot.slane %v1238_v45, 1  ;;  %v1256_v44 = vcombine.low %v1959_v27, %v1964_v28  ;;  %s461_s19 = sadd.s32 1, %s1682_s19  }
  0x26   : >> { %1271 = vmatpush3.bf16.msra.mxu0 %v1244_v38  ;;  %533 = vrot.lane.b32.xlu1 %v532_v47, %s1685_s28  ;;  %v528_v54 = vrot.slane %v526_v49, 1  ;;  %v535_v37 = vrot.slane %v524_v48, 1  ;;  %v536_v38 = vrot.slane %v526_v49, 2  ;;  %v546_v47 = vshrl.u32 %v2019_v41, 16  ;;  %p458_p11 = scmp.ge.s32.totalorder %s461_s19, 4  }
  0x27   : >> { %1272 = vmatprep.subr.bf16.mxu0 %v1253_v40  ;;  %v486_v56 = vrot.slane %v484_v52, 1  ;;  %v493_v57 = vrot.slane %v482_v51, 1  ;;  %v494_v58 = vrot.slane %v484_v52, 2  ;;  %v1247_v40 = vcombine.low %v1859_v9, %v1869_v10  ;;  %v758_v3 = vld [vmem:[%s2331_s3 + $0x20] sm:$0xff] (%p458_p11)  ;;  %v759_v4 = vld [vmem:[%s2331_s3 + $0x28] sm:$0xff] (%p458_p11)  ;;  %v847_v7 = vld [vmem:[%s2333_s5 + $0x10] sm:$0xff] (%p458_p11) }
  0x28   : >> { %v529_v60 = vor.u32 %v528_v54, %v524_v48  ;;  %v537_v45 = vor.u32 %v536_v38, %v535_v37  ;;  %v1248_v48 = vcombine.low %v1874_v11, %v1879_v12  ;;  %v1257_v49 = vcombine.low %v1969_v29, %v1974_v30  ;;  %v845_v5 = vld [vmem:[%s2333_s5] sm:$0xff] (%p458_p11)  ;;  %v846_v6 = vld [vmem:[%s2333_s5 + $0x8] sm:$0xff] (%p458_p11)  ;;  %v848_v9 = vld [vmem:[%s2333_s5 + $0x18] sm:$0xff] (%p458_p11)  ;;  %s1265_s16 = sshll.u32 (%p458_p11), %s1784_s10, 4  ;;  %s1130_s25 = sshll.u32 (%p458_p11), %s1993_s13, 4  ;;  %s1131_s25 = int_to_ptr.vmem [resolvable:$true] %s1130_s25 }
  0x29   : >> { %v487_v35 = vor.u32 %v486_v56, %v482_v51  ;;  %v495_v36 = vor.u32 %v494_v58, %v493_v57  ;;  %v512_v52 = vrot.slane %v2015_v39, 1  ;;  %v515_v54 = vrot.slane %v504_v62, 1  ;;  %v760_v11 = vld [vmem:[%s2331_s3 + $0x30] sm:$0xff] (%p458_p11)  ;;  %v761_v12 = vld [vmem:[%s2331_s3 + $0x38] sm:$0xff] (%p458_p11)  ;;  %v762_v17 = vld [vmem:[%s2331_s3 + $0x40] sm:$0xff] (%p458_p11)  ;;  %s1694_s21 = smov (%p458_p11), [#allocation3]  }
  0x2a   : >> { %1273 = vmatpush3.bf16.msra.mxu0 %v1245_v46  ;;  %530 = vrot.lane.b32.xlu0 %v529_v60, %s1686_s22  ;;  %v509_v46 = vor.u32 %v508_v63, %v504_v62  ;;  %v1249_v56 = vcombine.low %v1884_v13, %v1889_v14  ;;  %v1258_v57 = vcombine.low %v1979_v31, %v1984_v32  ;;  %v554_v58 = vrot.slane %v2019_v41, 1  ;;  %v849_v14 = vld [vmem:[%s2333_s5 + $0x20] sm:$0xff] (%p458_p11)  ;;  %v763_v18 = vld [vmem:[%s2331_s3 + $0x48] sm:$0xff] (%p458_p11)  ;;  %v851_v20 = vld [vmem:[%s2333_s5 + $0x30] sm:$0xff] (%p458_p11)  ;;  %s1608_s19 = sshll.u32 (%p458_p11), %s1694_s21, 4  ;;  %s1609_s19 = int_to_ptr.vmem [resolvable:$false] %s1608_s19 }
  0x2b   : >> { %1274 = vmatprep.subr.bf16.mxu0 %v1254_v50  ;;  %491 = vrot.lane.b32.xlu1 %v490_v55, %s1685_s28  ;;  %v550_v50 = vrot.slane %v548_v0, 1  ;;  %v516_v55 = vrot.slane %v506_v53, 2  ;;  %v557_v60 = vrot.slane %v546_v47, 1  ;;  %v1250_v39 = vcombine.low %v1899_v15, %v1904_v16  ;;  %v850_v15 = vld [vmem:[%s2333_s5 + $0x28] sm:$0xff] (%p458_p11)  ;;  %v852_v21 = vld [vmem:[%s2333_s5 + $0x38] sm:$0xff] (%p458_p11)  ;;  %v764_v23 = vld [vmem:[%s2331_s3 + $0x50] sm:$0xff] (%p458_p11)  ;;  %p1611_p1 = scmp.lt.s32.totalorder (%p458_p11), %s1131_s25, %s1609_s19 }
  0x2c   : >> { %vm572_vm3 = vcmask 523264   ;;  %vm575_vm4 = vcmask 654336   ;;  %vm578_vm5 = vcmask 785408   ;;  %vm581_vm6 = vcmask 916480   ;;  %v765_v24 = vld [vmem:[%s2331_s3 + $0x58] sm:$0xff] (%p458_p11)  ;;  %v853_v26 = vld [vmem:[%s2333_s5 + $0x40] sm:$0xff] (%p458_p11) }
  0x2d   : >> { %v551_v51 = vor.u32 %v550_v50, %v546_v47  ;;  %vm744_vm7 = vcmask 977920   ;;  %vm1692_vm8 = vmmov (%p458_p11), 0   ;;  %v1693_v1 = vmov (%p458_p11), 0.0   ;;  %v854_v27 = vld [vmem:[%s2333_s5 + $0x48] sm:$0xff] (%p458_p11)  ;;  %v766_v29 = vld [vmem:[%s2331_s3 + $0x60] sm:$0xff] (%p458_p11) }
  0x2e   : >> { %1275 = vmatpush3.bf16.msra.mxu0 %v1246_v59  ;;  %488 = vrot.lane.b32.xlu0 %v487_v35, %s1686_s22  ;;  %v517_v59 = vor.u32 %v516_v55, %v515_v54  ;;  %v1484_v8 = vpack.c.bf16 (%p458_p11), %v846_v6, %v845_v5  ;;  %v1469_v10 = vpack.c.bf16 (%p458_p11), %v759_v4, %v758_v3  ;;  %v767_v30 = vld [vmem:[%s2331_s3 + $0x68] sm:$0xff] (%p458_p11)  ;;  %vm770_vm9 = vcmask (%p458_p11), 982016   ;;  %v1026_v3 = vld [vmem:[%s2337_s9 + $0x10] sm:$0xff] (%p458_p11)  ;;  %v1027_v5 = vld [vmem:[%s2337_s9 + $0x18] sm:$0xff] (%p458_p11)  ;;  %s2285_s22 = scalar_lea.hbm (%p458_p11), %s2339_s11, %s1265_s16 }
  0x2f   : >> { %1276 = vmatprep.subr.bf16.mxu0 %v1255_v61  ;;  %496 = vrot.lane.b32.xlu1 %v495_v36, %s1687_s27  ;;  %v558_v61 = vrot.slane %v548_v0, 2  ;;  %v1487_v13 = vpack.c.bf16 (%p458_p11), %v848_v9, %v847_v7  ;;  %v1472_v16 = vpack.c.bf16 (%p458_p11), %v761_v12, %v760_v11  ;;  %v1490_v19 = vpack.c.bf16 (%p458_p11), %v850_v15, %v849_v14  ;;  %v1028_v7 = vld [vmem:[%s2337_s9 + $0x20] sm:$0xff] (%p458_p11)  ;;  %v1031_v11 = vld [vmem:[%s2337_s9 + $0x38] sm:$0xff] (%p458_p11)  ;;  %v1033_v14 = vld [vmem:[%s2337_s9 + $0x48] sm:$0xff] (%p458_p11) }
  0x30   : > { %1401 = vmatprep.mubr.msk.f32.mxu1 (%p458_p11), %vm1692_vm8, %v1693_v1  ;;  %v1475_v22 = vpack.c.bf16 (%p458_p11), %v763_v18, %v762_v17  ;;  %v1493_v25 = vpack.c.bf16 (%p458_p11), %v852_v21, %v851_v20  ;;  %v1478_v28 = vpack.c.bf16 (%p458_p11), %v765_v24, %v764_v23  ;;  %v1496_v31 = vpack.c.bf16 (%p458_p11), %v854_v27, %v853_v26 }
  0x31   : >> { %v559_v53 = vor.u32 %v558_v61, %v557_v60  ;;  %v1481_v32 = vpack.c.bf16 (%p458_p11), %v767_v30, %v766_v29  ;;  %vm861_vm10 = vcmask (%p458_p11), 1043456   ;;  %vm857_vm11 = vcmask (%p458_p11), 687104  }
  0x32   : >> { %1277 = vmatpush3.bf16.msra.mxu0 %v1247_v40  ;;  %538 = vrot.lane.b32.xlu0 %v537_v45, %s1687_s27  ;;  %v1523_v6 = vpack.c.bf16 (%p458_p11), %v1027_v5, %v1026_v3  ;;  %vm935_vm12 = vcmask (%p458_p11), 57344   ;;  %s2352_s27 = sand.u32 (%p458_p11), 1, %s1666_s24  }
  0x33   : >> { %1278 = vmatprep.subr.bf16.mxu0 %v1256_v44  ;;  %510 = vrot.lane.b32.xlu1 %v509_v46, %s1688_s29 }
  0x36   : >> { %1279 = vmatpush3.bf16.msra.mxu0 %v1248_v48  ;;  %552 = vrot.lane.b32.xlu0 %v551_v51, %s1688_s29  ;;  %s1115_s29 = scalar_lea.sflag (%p458_p11), [#allocation4], %s2352_s27 }
  0x37   : >> { %1280 = vmatprep.subr.bf16.mxu0 %v1257_v49  ;;  %513 = vrot.lane.b32.xlu1 %v512_v52, %s1689_s17 }
  0x3a   : >> { %1281 = vmatpush3.bf16.msra.mxu0 %v1249_v56  ;;  %555 = vrot.lane.b32.xlu0 %v554_v58, %s1689_s17  ;;  %s1604_s17 = scalar_lea.vmem (%p458_p11), %s1131_s25, 16 }
  0x3b   : >> { %1282 = vmatprep.subr.bf16.mxu0 %v1258_v57  ;;  %518 = vrot.lane.b32.xlu1 %v517_v59, %s1690_s18  ;;  %p1605_p12 = scmp.ne.s32.totalorder (%p458_p11), %s1131_s25, %s1604_s17 }
  0x3d   : > { %p1606_p13 = pnand (%p458_p11), %p1605_p12, %p1801_p5 }
  0x3e   : >> { %1283 = vmatpush3.bf16.msra.mxu0 %v1250_v39  ;;  %560 = vrot.lane.b32.xlu0 %v559_v53, %s1690_s18  ;;  %s1610_s18 = scalar_lea.vmem (%p458_p11), %s1609_s19, 32 }
  0x3f   : > { %p1607_p0 = pneg (%p458_p11), %p1606_p13  ;;  %p1612_p2 = scmp.lt.s32.totalorder (%p458_p11), %s1610_s18, %s1604_s17 }
  0x41   : > { %p1613_p3 = por (%p458_p11), %p1612_p2, %p1611_p1 }
  0x43   : > { %p1614_p4 = pnand (%p458_p11), %p1613_p3, %p1607_p0 }
  0x94   : >> { %v502_v62 = vpop.permute.xlu1 %501 }
  0x95   : >> { %v544_v63 = vpop.permute.xlu0 %543 }
  0x98   : >> { %v534_v35 = vpop.permute.xlu1 %533 }
  0x9c   : >> { %v531_v36 = vpop.permute.xlu0 %530 }
  0x9d   : >> { %v492_v37 = vpop.permute.xlu1 %491  ;;  %v587_v45 = vsel %vm562_vm0, %v2021_v42, %v531_v36 }
  0x9e   : >> { %v589_v49 = vsel %vm566_vm1, %v587_v45, %v534_v35 }
  0xa0   : >> { %v489_v41 = vpop.permute.xlu0 %488 }
  0xa1   : >> { %v497_v38 = vpop.permute.xlu1 %496  ;;  %v565_v0 = vsel %vm562_vm0, %v2023_v43, %v489_v41 }
  0xa2   : >> { %v568_v46 = vsel %vm566_vm1, %v565_v0, %v492_v37 }
  0xa3   : >> { %v571_v48 = vsel %vm569_vm2, %v568_v46, %v497_v38 }
  0xa4   : >> { %v539_v40 = vpop.permute.xlu0 %538  ;;  %v574_v54 = vsel %vm572_vm3, %v571_v48, %v502_v62  ;;  %v755_v48 = vld [vmem:[%s2331_s3 + $0x8] sm:$0xff] (%p458_p11) }
  0xa5   : >> { %v511_v44 = vpop.permute.xlu1 %510  ;;  %v591_v51 = vsel %vm569_vm2, %v589_v49, %v539_v40  ;;  %v1691_v49 = vmov (%p458_p11), 0.0|0.0  }
  0xa6   : >> { %v593_v55 = vsel %vm572_vm3, %v591_v51, %v544_v63  ;;  %v577_v57 = vsel %vm575_vm4, %v574_v54, %v511_v44  ;;  %1462 = vmatprep.subr.bf16.mxu0 (%p458_p11), %v1691_v49  ;;  %1483 = vmatprep.subr.bf16.mxu1 (%p458_p11), %v1691_v49 }
  0xa7   : > { %1485 = vmatpush3.bf16.msra.mxu1 (%p458_p11), %v1484_v8  ;;  %v1029_v8 = vld [vmem:[%s2337_s9 + $0x28] sm:$0xff] (%p458_p11) }
  0xa8   : >> { %v553_v47 = vpop.permute.xlu0 %552  ;;  %1486 = vmatprep.subr.bf16.mxu1 (%p458_p11), %v1691_v49  ;;  %v1526_v9 = vpack.c.bf16 (%p458_p11), %v1029_v8, %v1028_v7 }
  0xa9   : >> { %v514_v50 = vpop.permute.xlu1 %513  ;;  %v595_v56 = vsel %vm575_vm4, %v593_v55, %v553_v47  ;;  %v855_v55 = vld [vmem:[%s2333_s5 + $0x50] sm:$0xf] (%p458_p11) }
  0xaa   : >> { %v580_v42 = vsel %vm578_vm5, %v577_v57, %v514_v50  ;;  %v754_v50 = vld [vmem:[%s2331_s3] sm:$0xff] (%p458_p11)  ;;  %v938_v57 = vld [vmem:[%s2335_s7 + $0x8] sm:$0xff] (%p458_p11) }
  0xab   : > { %v1463_v51 = vpack.c.bf16 (%p458_p11), %v755_v48, %v754_v50  ;;  %1488 = vmatpush3.bf16.msra.mxu1 (%p458_p11), %v1487_v13  ;;  %v949_v50 = vld [vmem:[%s2335_s7 + $0x60] sm:$0xff] (%p458_p11)  ;;  %v950_v48 = vld [vmem:[%s2335_s7 + $0x68] sm:$0xff] (%p458_p11) }
  0xac   : >> { %v556_v52 = vpop.permute.xlu0 %555  ;;  %1489 = vmatprep.subr.bf16.mxu1 (%p458_p11), %v1691_v49  ;;  %v1032_v13 = vld [vmem:[%s2337_s9 + $0x40] sm:$0xff] (%p458_p11) }
  0xad   : >> { %v519_v43 = vpop.permute.xlu1 %518  ;;  %v597_v58 = vsel %vm578_vm5, %v595_v56, %v556_v52  ;;  %v757_v52 = vld [vmem:[%s2331_s3 + $0x18] sm:$0xff] (%p458_p11)  ;;  %v769_v56 = vld [vmem:[%s2332_s4] sm:$0x1] (%p458_p11)  ;;  %v1532_v15 = vpack.c.bf16 (%p458_p11), %v1033_v14, %v1032_v13 }
  0xae   : >> { %v583_v61 = vsel %vm581_vm6, %v580_v42, %v519_v43  ;;  %v937_v43 = vld [vmem:[%s2335_s7] sm:$0xff] (%p458_p11) }
  0xaf   : > { %1491 = vmatpush3.bf16.msra.mxu1 (%p458_p11), %v1490_v19 }
  0xb0   : >> { %v561_v59 = vpop.permute.xlu0 %560  ;;  %1492 = vmatprep.subr.bf16.mxu1 (%p458_p11), %v1691_v49 }
  0xb1   : >> { %v599_v60 = vsel %vm581_vm6, %v597_v58, %v561_v59 }
  0xb2   : >> { %735 = vmatprep.mubr.bf16.mxu0 %v599_v60  ;;  %v1499_v60 = vpack.c.bf16 (%p458_p11), %v938_v57, %v937_v43 }
  0xb3   : >> { %736 = vmatmul.mubr.bf16.vlgmr.msra.gmra.mrb[0].mxu0 %v583_v61  ;;  %1494 = vmatpush3.bf16.msra.mxu1 (%p458_p11), %v1493_v25 }
  0xb4   : > { %1376 = vmatprep.mubr.msk.f32.mxu0 (%p458_p11), %vm1692_vm8, %v1693_v1  ;;  %1464 = vmatpush3.bf16.msra.mxu0 (%p458_p11), %v1463_v51  ;;  %v951_v51 = vld [vmem:[%s2335_s7 + $0x70] sm:$0xff] (%p458_p11) }
  0xb5   : > { %1465 = vmatprep.subr.bf16.mxu0 (%p458_p11), %v1691_v49  ;;  %1495 = vmatprep.subr.bf16.mxu1 (%p458_p11), %v1691_v49 }
  0xb7   : > { %1497 = vmatpush3.bf16.msra.mxu1 (%p458_p11), %v1496_v31 }
  0xb8   : > { %1399 = vmatprep.subr.mxu1 (%p458_p11), %v1693_v1 }
  0xbb   : > { %1400 = vmatpush3.msk.msra.mxu1 (%p458_p11), %vm861_vm10, %v855_v55 }
  0xbc   : > { %1498 = vmatprep.subr.bf16.mxu1 (%p458_p11), %v1691_v49 }
 0x186   : >> { %v1284_v39 = vpop.f32.mrb[0].mxu0 }
 0x187   : >> { %v1285_v53 = vpop.f32.mrb[1].mxu0 }
 0x188   : >> { %v1286_v35 = vadd.f32 %v1285_v53, %v1284_v39  ;;  %v1287_v36 = vpop.f32.mrb[2].mxu0  ;;  %v939_v39 = vld [vmem:[%s2335_s7 + $0x10] sm:$0xff] (%p458_p11)  ;;  %v940_v53 = vld [vmem:[%s2335_s7 + $0x18] sm:$0xff] (%p458_p11) }
 0x189   : >> { %v1288_v37 = vpop.f32.mrb[3].mxu0  ;;  %v941_v36 = vld [vmem:[%s2335_s7 + $0x20] sm:$0xff] (%p458_p11) }
 0x18a   : >> { %v738_v62 = vadd.f32 %v1286_v35, %v1989_v33  ;;  %v768_v33 = vld [vmem:[%s2331_s3 + $0x70] sm:$0xff] (%p458_p11)  ;;  %v1502_v35 = vpack.c.bf16 (%p458_p11), %v940_v53, %v939_v39  ;;  %v942_v37 = vld [vmem:[%s2335_s7 + $0x28] sm:$0xff] (%p458_p11) }
 0x18c   : >> { %v743_v63 = vmax.f32 %v738_v62, 0.0  ;;  %v1505_v62 = vpack.c.bf16 (%p458_p11), %v942_v37, %v941_v36 }
 0x18e   : >> { %v745_v41 = vsel %vm744_vm7, %v743_v63, 0.0  ;;  %v943_v63 = vld [vmem:[%s2335_s7 + $0x30] sm:$0xff] (%p458_p11) }
 0x18f   : >> { %v746_v38 = vrot.slane %v745_v41, 4 }
 0x191   : >> { %v747_v0 = vadd.f32 %v746_v38, %v745_v41  ;;  %v944_v41 = vld [vmem:[%s2335_s7 + $0x38] sm:$0xff] (%p458_p11) }
 0x192   : > { %v1508_v38 = vpack.c.bf16 (%p458_p11), %v944_v41, %v943_v63 }
 0x193   : >> { %v748_v40 = vrot.slane %v747_v0, 2 }
 0x195   : >> { %v749_v44 = vadd.f32 %v748_v40, %v747_v0  ;;  %v945_v0 = vld [vmem:[%s2335_s7 + $0x40] sm:$0xff] (%p458_p11)  ;;  %v946_v40 = vld [vmem:[%s2335_s7 + $0x48] sm:$0xff] (%p458_p11) }
 0x197   : >> { %v750_v45 = vrot.slane %v749_v44, 1 }
 0x198   : > { %460 = sbr.rel (!%p458_p11) target bundleno = 31 (0x1f), region = 122 }
 0x199   : >> { %v751_v46 = vadd.f32 %v750_v45, %v749_v44  ;;  %v1511_v44 = vpack.c.bf16 (%p458_p11), %v946_v40, %v945_v0  ;;  %v947_v45 = vld [vmem:[%s2335_s7 + $0x50] sm:$0xff] (%p458_p11) }
 0x19b   : >> { %v2063_v34 = vadd.f32 %v1678_v34, %v751_v46   ;;  %v948_v46 = vld [vmem:[%s2335_s7 + $0x58] sm:$0xff] (%p458_p11) }
 0x19d   : >> { %v2350_v47 = vmov %v2063_v34 }
 0x19e   : >> { %v2351_v34 = vmov %v2350_v47  ;;  %v753_v54 = vmul.f32 (%p458_p11), 0.0625, %v2350_v47  ;;  %v1514_v47 = vpack.c.bf16 (%p458_p11), %v948_v46, %v947_v45 }
 0x19f   : > { %v756_v34 = vld [vmem:[%s2331_s3 + $0x10] sm:$0xff] }
 0x1a0   : > { %v1466_v2 = vpack.c.bf16 %v757_v52, %v756_v34  ;;  %v1517_v34 = vpack.c.bf16 %v950_v48, %v949_v50  ;;  %v1024_v52 = vld [vmem:[%s2337_s9] sm:$0xff] }
 0x1a2   : > { %1467 = vmatpush3.bf16.msra.mxu0 %v1466_v2  ;;  %v1025_v2 = vld [vmem:[%s2337_s9 + $0x8] sm:$0xff] }
 0x1a3   : > { %1468 = vmatprep.subr.bf16.mxu0 %v1691_v49  ;;  %v1520_v4 = vpack.c.bf16 %v1025_v2, %v1024_v52 }
 0x1a6   : > { %1470 = vmatpush3.bf16.msra.mxu0 %v1469_v10  ;;  %v1030_v10 = vld [vmem:[%s2337_s9 + $0x30] sm:$0xff] }
 0x1a7   : > { %1471 = vmatprep.subr.bf16.mxu0 %v1691_v49  ;;  %v1529_v12 = vpack.c.bf16 %v1031_v11, %v1030_v10 }
 0x1aa   : > { %1473 = vmatpush3.bf16.msra.mxu0 %v1472_v16  ;;  %v1034_v16 = vld [vmem:[%s2337_s9 + $0x50] sm:$0xf] }
 0x1ab   : > { %1474 = vmatprep.subr.bf16.mxu0 %v1691_v49 }
 0x1ae   : > { %1476 = vmatpush3.bf16.msra.mxu0 %v1475_v22 }
 0x1af   : > { %1477 = vmatprep.subr.bf16.mxu0 %v1691_v49 }
 0x1b2   : > { %1479 = vmatpush3.bf16.msra.mxu0 %v1478_v28 }
 0x1b3   : > { %1480 = vmatprep.subr.bf16.mxu0 %v1691_v49 }
 0x1b6   : > { %1482 = vmatpush3.bf16.msra.mxu0 %v1481_v32 }
 0x1b7   : > { %1374 = vmatprep.subr.mxu0 %v1693_v1 }
 0x1ba   : > { %1375 = vmatpush3.msra.mxu0 %v768_v33 }
 0x1bb   : > { %1377 = vmatmul.mubr.msk.f32.vlgmr.msra.gmra.mrb[0].mxu0 %vm770_vm9, %v753_v54  ;;  %1519 = vmatprep.subr.bf16.mxu0 %v1691_v49 }
 0x1bc   : > { %1459 = vmatprep.mubr.msk.f32.mxu0 %vm1692_vm8, %v1693_v1  ;;  %1521 = vmatpush3.bf16.msra.mxu0 %v1520_v4 }
 0x1bd   : > { %1522 = vmatprep.subr.bf16.mxu0 %v1691_v49 }
 0x1c0   : > { %1524 = vmatpush3.bf16.msra.mxu0 %v1523_v6 }
 0x1c1   : > { %1525 = vmatprep.subr.bf16.mxu0 %v1691_v49 }
 0x1c4   : > { %1527 = vmatpush3.bf16.msra.mxu0 %v1526_v9 }
 0x1c5   : > { %1528 = vmatprep.subr.bf16.mxu0 %v1691_v49 }
 0x1c8   : > { %1530 = vmatpush3.bf16.msra.mxu0 %v1529_v12 }
 0x1c9   : > { %1531 = vmatprep.subr.bf16.mxu0 %v1691_v49 }
 0x1cc   : > { %1533 = vmatpush3.bf16.msra.mxu0 %v1532_v15 }
 0x1cd   : > { %1457 = vmatprep.subr.mxu0 %v1693_v1 }
 0x1d0   : > { %1458 = vmatpush3.msk.msra.mxu0 %vm861_vm10, %v1034_v16 }
 0x28e   : > { %v840_v58 = vpop.f32.mrb[0].mxu0 }
 0x28f   : > { %v841_v59 = vadd.f32 %v840_v58, %v769_v56  ;;  %v1378_v42 = vpop.f32.mrb[1].mxu0 }
 0x291   : > { %v844_v61 = vmax.f32 %v841_v59, 0.0 }
 0x293   : > { %1402 = vmatmul.mubr.msk.f32.vlgmr.msra.gmra.mrb[0].mxu1 %vm857_vm11, %v844_v61 }
 0x294   : > { %1500 = vmatpush3.bf16.msra.mxu1 %v1499_v60  ;;  %1434 = vmatprep.mubr.msk.f32.mxu1 %vm1692_vm8, %v1693_v1 }
 0x295   : > { %1501 = vmatprep.subr.bf16.mxu1 %v1691_v49 }
 0x298   : > { %1503 = vmatpush3.bf16.msra.mxu1 %v1502_v35 }
 0x299   : > { %1504 = vmatprep.subr.bf16.mxu1 %v1691_v49 }
 0x29c   : > { %1506 = vmatpush3.bf16.msra.mxu1 %v1505_v62 }
 0x29d   : > { %1507 = vmatprep.subr.bf16.mxu1 %v1691_v49 }
 0x2a0   : > { %1509 = vmatpush3.bf16.msra.mxu1 %v1508_v38 }
 0x2a1   : > { %1510 = vmatprep.subr.bf16.mxu1 %v1691_v49 }
 0x2a4   : > { %1512 = vmatpush3.bf16.msra.mxu1 %v1511_v44 }
 0x2a5   : > { %1513 = vmatprep.subr.bf16.mxu1 %v1691_v49 }
 0x2a8   : > { %1515 = vmatpush3.bf16.msra.mxu1 %v1514_v47 }
 0x2a9   : > { %1516 = vmatprep.subr.bf16.mxu1 %v1691_v49  ;;  %v856_v49 = vld [vmem:[%s2334_s6] sm:$0x1] }
 0x2ac   : > { %1518 = vmatpush3.bf16.msra.mxu1 %v1517_v34 }
 0x2ad   : > { %1432 = vmatprep.subr.mxu1 %v1693_v1  ;;  %v952_v1 = vld [vmem:[%s2336_s8] sm:$0x1] }
 0x2b0   : > { %1433 = vmatpush3.msra.mxu1 %v951_v51 }
 0x2b1   : > { %1435 = vmatmul.mubr.msk.f32.vlgmr.msra.gmra.mrb[2].mxu1 %vm770_vm9, %v753_v54 }
 0x366   : > { %v931_v17 = vpop.f32.mrb[0].mxu1 }
 0x367   : > { %v932_v18 = vadd.f32 %v931_v17, %v856_v49  ;;  %v1403_v19 = vpop.f32.mrb[1].mxu1 }
 0x369   : > { %936 = vst.msk [vmem:[%s1993_s13] sm:$0x1] %vm935_vm12, %v932_v18 }
 0x384   : > { %v1019_v20 = vpop.f32.mrb[2].mxu1 }
 0x385   : > { %v1020_v21 = vadd.f32 %v1019_v20, %v952_v1  ;;  %v1436_v22 = vpop.f32.mrb[3].mxu1 }
 0x387   : > { %v1023_v23 = vmax.f32 %v1020_v21, 0.0 }
 0x389   : > { %1460 = vmatmul.mubr.msk.f32.vlgmr.msra.gmra.mrb[2].mxu0 %vm857_vm11, %v1023_v23 }
 0x38a   : > { %1617 = shalt.err (!%p1614_p4)
}
 0x38b   : > { %s1618_s10 = scalar_lea.hbm %s2285_s22, 16  ;;  %s1622_s20 = scalar_lea.hbm %s2339_s11, 32 }
 0x38c   : > { %p1619_p7 = scmp.ne.s32.totalorder %s2285_s22, %s1618_s10  ;;  %p1623_p10 = scmp.lt.u32.totalorder %s2285_s22, %s2339_s11 }
 0x38d   : > { %p1624_p11 = scmp.lt.u32.totalorder %s1622_s20, %s1618_s10  ;;  %p1626_p13 = scmp.lt.u32.totalorder %s1618_s10, %s2285_s22 }
 0x38e   : > { %p1620_p8 = pnand %p1619_p7, %p1801_p5 }
 0x38f   : > { %p1625_p12 = por %p1624_p11, %p1623_p10 }
 0x390   : > { %p1621_p9 = pneg %p1620_p8 }
 0x391   : > { %p1627_p0 = por %p1626_p13, %p1625_p12 }
 0x393   : > { %p1628_p1 = pnand %p1627_p0, %p1621_p9 }
 0x395   : > { %1631 = shalt.err (!%p1628_p1)
}
 0x396   : > { %1535 = dma.vmem_to_hbm [thread:$0]  (%p1801_p5), %s1131_s25, 16, %s2285_s22, %s1115_s29   ;;  %v1035_v24 = vld [vmem:[#allocation2] sm:$0x1]  ;;  %vm1112_vm13 = vcmask 0  }
 0x397   : > { %s2353_s19 = scalar_lea.vmem %s2340_s12, %s1834_s30 }
 0x45c   : > { %v1108_v25 = vpop.f32.mrb[2].mxu0 }
 0x45d   : > { %v1109_v26 = vadd.f32 %v1108_v25, %v1035_v24  ;;  %v1461_v27 = vpop.f32.mrb[3].mxu0 }
 0x45f   : > { %1113 = vst.msk [vmem:[%s2353_s19] sm:$0x1] %vm1112_vm13, %v1109_v26 }
 0x460 PF: > { %p1541_p2 = scmp.ge.s32.totalorder %s1674_s26, 2  ;;  %s1145_s18 = sand.u32 1, %s1662_s23  }
 0x461   : > { %s1146_s14 = scalar_lea.sflag [#allocation4], %s1145_s18 }
 0x462   : > { %p1538_p3 = pnand %p1541_p2, %p1805_p6 }
 0x464   : > { %1657 = dma.done.wait (!%p1538_p3), %s1146_s14, 16  }
 0x465   : > { %1659 = vsyncadd (!%p1538_p3), %s1146_s14, 4294967280  ;;  %s2354_s26 = sld [smem:[#allocation7_spill]]  ;;  %s2355_s25 = sld [smem:[#allocation6_spill]] }
 0x466   : > { %s2356_s22 = sld [smem:[#allocation8_spill]]  ;;  %s2357_s23 = smov %s1666_s24 }
 0x46b   : > { %p25_p5 = scmp.ge.s32.totalorder %s2354_s26, 4   ;;  %s2358_s24 = smov %s2355_s25 }
 0x46c   : > { %s2359_s25 = smov %s2356_s22 }
 0x46d   :  { %27 = sbr.rel (!%p25_p5) target bundleno = 6 (0x6), region = 133 }
 0x474   :  { %1156 = vsyncpa [#allocation4], 1 }
 0x475   :  { %1158 = vsyncpa [#allocation4 + $0x1], 1 }

</bundles_post_ra>
